<compile_context>
chip_gen: v7x
topology: tpu7x:2x2x1
jax: 0.10.0
libtpu: 0.0.40
codegen_flags: <defaults>
</compile_context>

<pallas_src>
import functools

import jax
import jax.numpy as jnp
from jax.experimental import pallas as pl
from jax.experimental.pallas import tpu as pltpu


def mha_kernel(x_ref, wqkv_ref, bqkv_ref, wp_ref, bp_ref, o_ref, *,
               num_heads: int, seq_len: int, head_dim_pad: int):
    rows, _ = x_ref.shape
    n = seq_len
    bs = rows // n                       # batches handled by this grid step
    dp = head_dim_pad                    # per-head lane-padded width (>=128)
    e_pad = wp_ref.shape[1]              # lane-padded projection width (>=128)
    mm_dtype = wqkv_ref.dtype            # bf16 (default) or f32 for the big QKV dot

    # Fused Q/K/V projection over all rows of this block.  Single in-kernel cast
    # of the f32 input (rides in VPU slack); f32 accumulation; 1/sqrt(E) scale is
    # already folded into the (per-head lane-padded) Q columns.
    qkv = jnp.dot(x_ref[...].astype(mm_dtype), wqkv_ref[...],
                  preferred_element_type=jnp.float32) + bqkv_ref[...]

    # Hoisted bias broadcast for the output projection (zero-padded past E).
    bias_rows = jnp.broadcast_to(bp_ref[...], (n, e_pad))

    # Static loops: fine at B<=2, H<=4 unrolled bodies.
    for b in range(bs):
        r0 = b * n                                       # multiple of n (8-aligned)
        acc = bias_rows                                  # (N, E_pad) f32
        for h in range(num_heads):
            q0 = h * dp
            k0 = (num_heads + h) * dp
            v0 = (2 * num_heads + h) * dp
            # 128-lane-aligned, 8-sublane-aligned views; padded lanes are zero.
            qh = qkv[r0:r0 + n, q0:q0 + dp]              # (N, Dp) f32, pre-scaled
            kh = qkv[r0:r0 + n, k0:k0 + dp]              # (N, Dp)
            vh = qkv[r0:r0 + n, v0:v0 + dp]              # (N, Dp)

            # 'qd,kd->qk' contracting last dims (no k transpose / relayout).
            # Zero-padded lanes contribute nothing to the contraction.
            energy = jax.lax.dot_general(
                qh, kh,
                dimension_numbers=(((1,), (1,)), ((), ())),
                preferred_element_type=jnp.float32)      # (N, N)

            # Softmax in f32 (scale pre-folded into Q on the host).
            s = energy - jnp.max(energy, axis=-1, keepdims=True)
            p = jnp.exp(s)
            inv_l = pl.reciprocal(jnp.sum(p, axis=-1, keepdims=True), approx=True)
            att = p * inv_l
            # att_drop: identity at inference; mask is None in this path.

            oh = jnp.dot(att, vh, preferred_element_type=jnp.float32)   # (N, Dp)

            # Fuse the head-concat into the output projection: accumulate against
            # the matching 128-row-aligned sublane slice of the padded Wp.
            acc = acc + jnp.dot(oh, wp_ref[q0:q0 + dp, :],
                                preferred_element_type=jnp.float32)

        o_ref[r0:r0 + n, :] = acc.astype(o_ref.dtype)    # lane-dense (E_pad) store


def _pad_head_cols(wT, H, D, Dp):
    """(E_in, H*D) -> (E_in, H*Dp): zero-pad each head's output columns to Dp lanes."""
    e_in = wT.shape[0]
    w = wT.reshape(e_in, H, D)
    w = jnp.pad(w, ((0, 0), (0, 0), (0, Dp - D)))
    return w.reshape(e_in, H * Dp)


def _pad_head_bias(b, H, D, Dp):
    """(H*D,) -> (H*Dp,): zero-pad each head's bias slice to Dp lanes."""
    b = b.reshape(H, D)
    b = jnp.pad(b, ((0, 0), (0, Dp - D)))
    return b.reshape(H * Dp)


def _pad_head_rows(wT, H, D, Dp, E_pad):
    """(H*D, E_out) -> (H*Dp, E_pad): zero-pad per-head input rows and output lanes."""
    e_out = wT.shape[1]
    w = wT.reshape(H, D, e_out)
    w = jnp.pad(w, ((0, 0), (0, Dp - D), (0, E_pad - e_out)))
    return w.reshape(H * Dp, E_pad)


def _default_grid_blocks(B: int, N: int) -> int:
    """grid is a serial loop on one TensorCore, so default to 1 block on v5e/v6e.
    Use 2 blocks only when a second TensorCore exists (v7x) and each block keeps
    clean 8-row f32 tiles (x stays f32, so the (8,128) tile is the constraint)."""
    try:
        kind = jax.devices()[0].device_kind.lower()
    except Exception:
        kind = ""
    dual_tc = ("v7" in kind) or ("7x" in kind)
    rows_half = (B // 2) * N
    if dual_tc and B % 2 == 0 and rows_half >= 8 and rows_half % 8 == 0:
        return 2
    return 1


def multi_head_attention(x, params, *, num_heads: int,
                         matmul_dtype=jnp.bfloat16, grid_blocks=None):
    """x: (B, N, E) float32. params: dict of PyTorch-convention weights."""
    B, N, E = x.shape
    assert E % num_heads == 0
    D = E // num_heads
    Dp = max(128, ((D + 127) // 128) * 128)       # per-head lane-padded width
    E_pad = max(128, ((E + 127) // 128) * 128)    # projection output lane pad

    # ---- Host-side weight prep (nn.Linear: y = x @ W.T + b) ----------------
    # Fold the (nonstandard, intentional) 1/sqrt(emb_size) scale into Wq / bq,
    # and lane-pad each head's Q/K/V column group to Dp so every per-head slice
    # inside the kernel is 128-lane aligned.
    scale = 1.0 / (float(E) ** 0.5)
    wqkv = jnp.concatenate(
        [_pad_head_cols(params["wq"].T * scale, num_heads, D, Dp),
         _pad_head_cols(params["wk"].T, num_heads, D, Dp),
         _pad_head_cols(params["wv"].T, num_heads, D, Dp)],
        axis=1).astype(matmul_dtype)                                   # (E, 3*H*Dp)
    bqkv = jnp.concatenate(
        [_pad_head_bias(params["bq"] * scale, num_heads, D, Dp),
         _pad_head_bias(params["bk"], num_heads, D, Dp),
         _pad_head_bias(params["bv"], num_heads, D, Dp)]
    ).reshape(1, 3 * num_heads * Dp).astype(jnp.float32)               # (1, 3*H*Dp)

    # Output projection: per-head row padding to Dp + lane padding to E_pad.
    # Kept in f32: the tiny per-head dots stay f32 (MXU is latency-bound here).
    wp = _pad_head_rows(params["wp"].T, num_heads, D, Dp, E_pad
                        ).astype(jnp.float32)                          # (H*Dp, E_pad)
    bp = jnp.zeros((1, E_pad), jnp.float32).at[:, :E].set(
        params["bp"].reshape(1, E))                                    # (1, E_pad)

    # Flatten batch*seq; keep f32 (clean (8,128) tiling; cast happens in-kernel).
    x2d = x.reshape(B * N, E).astype(jnp.float32)

    if grid_blocks is None:
        grid_blocks = _default_grid_blocks(B, N)
    assert B % grid_blocks == 0
    rows = (B // grid_blocks) * N

    kernel = functools.partial(mha_kernel, num_heads=num_heads, seq_len=N,
                               head_dim_pad=Dp)

    out = pl.pallas_call(
        kernel,
        out_shape=jax.ShapeDtypeStruct((B * N, E_pad), jnp.float32),
        grid_spec=pltpu.PrefetchScalarGridSpec(
            num_scalar_prefetch=0,
            grid=(grid_blocks,),
            in_specs=[
                pl.BlockSpec((rows, E), lambda g: (g, 0)),              # x (f32)
                pl.BlockSpec((E, 3 * num_heads * Dp), lambda g: (0, 0)),  # Wqkv
                pl.BlockSpec((1, 3 * num_heads * Dp), lambda g: (0, 0)),  # bqkv
                pl.BlockSpec((num_heads * Dp, E_pad), lambda g: (0, 0)),  # Wp
                pl.BlockSpec((1, E_pad), lambda g: (0, 0)),               # bp
            ],
            out_specs=pl.BlockSpec((rows, E_pad), lambda g: (g, 0)),
        ),
        compiler_params=pltpu.CompilerParams(
            dimension_semantics=("parallel",)),
    )(x2d, wqkv, bqkv, wp, bp)

    # Host-side slice of the lane-padded output (tiny at this shape).
    return out[:, :E].reshape(B, N, E).astype(x.dtype)


def mha_reference(x, params, *, num_heads: int):
    """Pure-JAX f32 reference mirroring the PyTorch forward (mask=None, eval)."""
    B, N, E = x.shape
    D = E // num_heads

    def lin(x, w, b):
        return jnp.einsum("bne,oe->bno", x, w) + b

    q = lin(x, params["wq"], params["bq"]).reshape(B, N, num_heads, D).transpose(0, 2, 1, 3)
    k = lin(x, params["wk"], params["bk"]).reshape(B, N, num_heads, D).transpose(0, 2, 1, 3)
    v = lin(x, params["wv"], params["bv"]).reshape(B, N, num_heads, D).transpose(0, 2, 1, 3)

    energy = jnp.einsum("bhqd,bhkd->bhqk", q, k)
    att = jax.nn.softmax(energy / (E ** 0.5), axis=-1)
    out = jnp.einsum("bhal,bhlv->bhav", att, v)
    out = out.transpose(0, 2, 1, 3).reshape(B, N, E)
    return lin(out, params["wp"], params["bp"])


def init_params(key, emb_size):
    """Deterministic nn.Linear-style init: U(-1/sqrt(in), 1/sqrt(in))."""
    bound = 1.0 / (emb_size ** 0.5)
    keys = jax.random.split(key, 8)
    u = lambda k, shape: jax.random.uniform(k, shape, jnp.float32, -bound, bound)
    return {
        "wq": u(keys[0], (emb_size, emb_size)), "bq": u(keys[1], (emb_size,)),
        "wk": u(keys[2], (emb_size, emb_size)), "bk": u(keys[3], (emb_size,)),
        "wv": u(keys[4], (emb_size, emb_size)), "bv": u(keys[5], (emb_size,)),
        "wp": u(keys[6], (emb_size, emb_size)), "bp": u(keys[7], (emb_size,)),
    }


if __name__ == "__main__":
    B, N, E, H = 2, 8, 32, 4      # batch, seq, emb_size, num_heads
    dropout = 0.1                 # unused at inference (att_drop == identity)

    root = jax.random.PRNGKey(0)
    kx, kp = jax.random.split(root)
    x = jax.random.normal(kx, (B, N, E), jnp.float32)
    params = init_params(kp, E)

    ref = mha_reference(x, params, num_heads=H)

    # Exact-f32 matmul path: tight check (only approx-reciprocal softmax differs).
    out_f32 = jax.block_until_ready(
        multi_head_attention(x, params, num_heads=H, matmul_dtype=jnp.float32))
    assert out_f32.shape == (B, N, E)
    assert jnp.allclose(out_f32, ref, atol=5e-3, rtol=5e-3), "f32 mismatch vs reference"

    # Default path (bf16 only on the big QKV projection; per-head dots stay f32).
    out_bf16 = jax.block_until_ready(
        multi_head_attention(x, params, num_heads=H))
    assert out_bf16.shape == (B, N, E)
    assert jnp.allclose(out_bf16, ref, atol=3e-2, rtol=3e-2), "bf16 mismatch vs reference"

    print("KERNEL_OK")
</pallas_src>

<mosaic_0001>
module attributes {stable_mosaic.version = 11 : i64} {
  func.func @mha_kernel(%arg0: i32, %arg1: memref<16x32xf32, #tpu.memory_space<vmem>>, %arg2: memref<32x1536xf32, #tpu.memory_space<vmem>>, %arg3: memref<1x1536xf32, #tpu.memory_space<vmem>>, %arg4: memref<512x128xf32, #tpu.memory_space<vmem>>, %arg5: memref<1x128xf32, #tpu.memory_space<vmem>>, %arg6: memref<16x128xf32, #tpu.memory_space<vmem>>) attributes {dimension_semantics = [#tpu.dimension_semantics<parallel>], iteration_bounds = array<i64: 1>, scalar_prefetch = 0 : i64, scratch_operands = 0 : i64, tpu.core_type = #tpu.core_type<tc>, window_params = [{transform_indices = @transform_0, window_bounds = array<i64: 16, 32>}, {pipeline_mode = #tpu.pipeline_mode<synchronous>, transform_indices = @transform_1, window_bounds = array<i64: 32, 1536>}, {pipeline_mode = #tpu.pipeline_mode<synchronous>, transform_indices = @transform_2, window_bounds = array<i64: 1, 1536>}, {pipeline_mode = #tpu.pipeline_mode<synchronous>, transform_indices = @transform_3, window_bounds = array<i64: 512, 128>}, {pipeline_mode = #tpu.pipeline_mode<synchronous>, transform_indices = @transform_4, window_bounds = array<i64: 1, 128>}, {transform_indices = @transform_5, window_bounds = array<i64: 16, 128>}]} {
    %c0 = arith.constant 0 : index
    %c0_0 = arith.constant 0 : index
    %0 = vector.load %arg1[%c0, %c0_0] : memref<16x32xf32, #tpu.memory_space<vmem>>, vector<16x32xf32>
    %c0_1 = arith.constant 0 : index
    %c0_2 = arith.constant 0 : index
    %1 = vector.load %arg2[%c0_1, %c0_2] : memref<32x1536xf32, #tpu.memory_space<vmem>>, vector<32x1536xf32>
    %cst = arith.constant dense<0.000000e+00> : vector<16x1536xf32>
    %2 = tpu.matmul %0, %1, %cst {dimension_numbers = #tpu.dot_dimension_numbers<[1], [0], [0], [1], [0, 0, 1, 1], [], []>} : vector<16x32xf32>, vector<32x1536xf32>, vector<16x1536xf32> -> vector<16x1536xf32>
    %c0_3 = arith.constant 0 : index
    %c0_4 = arith.constant 0 : index
    %3 = vector.load %arg3[%c0_3, %c0_4] : memref<1x1536xf32, #tpu.memory_space<vmem>>, vector<1x1536xf32>
    %4 = vector.broadcast %3 : vector<1x1536xf32> to vector<16x1536xf32>
    %5 = arith.addf %2, %4 : vector<16x1536xf32>
    %c0_5 = arith.constant 0 : index
    %c0_6 = arith.constant 0 : index
    %6 = vector.load %arg5[%c0_5, %c0_6] : memref<1x128xf32, #tpu.memory_space<vmem>>, vector<1x128xf32>
    %7 = vector.shape_cast %6 : vector<1x128xf32> to vector<1x128xf32>
    %8 = vector.broadcast %7 : vector<1x128xf32> to vector<8x128xf32>
    %9 = vector.extract_strided_slice %5 {offsets = [0, 0], sizes = [8, 128], strides = [1, 1]} : vector<16x1536xf32> to vector<8x128xf32>
    %10 = vector.extract_strided_slice %5 {offsets = [0, 512], sizes = [8, 128], strides = [1, 1]} : vector<16x1536xf32> to vector<8x128xf32>
    %11 = vector.extract_strided_slice %5 {offsets = [0, 1024], sizes = [8, 128], strides = [1, 1]} : vector<16x1536xf32> to vector<8x128xf32>
    %cst_7 = arith.constant dense<0.000000e+00> : vector<8x8xf32>
    %12 = tpu.matmul %9, %10, %cst_7 {dimension_numbers = #tpu.dot_dimension_numbers<[1], [1], [0], [0], [0, 0, 1, 0], [], []>} : vector<8x128xf32>, vector<8x128xf32>, vector<8x8xf32> -> vector<8x8xf32>
    %cst_8 = arith.constant dense<0xFF800000> : vector<8xf32>
    %13 = vector.multi_reduction <maximumf>, %12, %cst_8 [1] : vector<8x8xf32> to vector<8xf32>
    %14 = vector.shape_cast %13 : vector<8xf32> to vector<8x1xf32>
    %15 = vector.broadcast %14 : vector<8x1xf32> to vector<8x8xf32>
    %16 = arith.subf %12, %15 : vector<8x8xf32>
    %17 = math.exp %16 : vector<8x8xf32>
    %cst_9 = arith.constant dense<0.000000e+00> : vector<8xf32>
    %18 = vector.multi_reduction <add>, %17, %cst_9 [1] : vector<8x8xf32> to vector<8xf32>
    %19 = vector.shape_cast %18 : vector<8xf32> to vector<8x1xf32>
    %20 = tpu.reciprocal %19 {approx = true} : vector<8x1xf32> -> vector<8x1xf32>
    %21 = vector.broadcast %20 : vector<8x1xf32> to vector<8x8xf32>
    %22 = arith.mulf %17, %21 : vector<8x8xf32>
    %cst_10 = arith.constant dense<0.000000e+00> : vector<8x128xf32>
    %23 = tpu.matmul %22, %11, %cst_10 {dimension_numbers = #tpu.dot_dimension_numbers<[1], [0], [0], [1], [0, 0, 1, 1], [], []>} : vector<8x8xf32>, vector<8x128xf32>, vector<8x128xf32> -> vector<8x128xf32>
    %c0_11 = arith.constant 0 : index
    %c0_12 = arith.constant 0 : index
    %24 = vector.load %arg4[%c0_11, %c0_12] : memref<512x128xf32, #tpu.memory_space<vmem>>, vector<128x128xf32>
    %cst_13 = arith.constant dense<0.000000e+00> : vector<8x128xf32>
    %25 = tpu.matmul %23, %24, %cst_13 {dimension_numbers = #tpu.dot_dimension_numbers<[1], [0], [0], [1], [0, 0, 1, 1], [], []>} : vector<8x128xf32>, vector<128x128xf32>, vector<8x128xf32> -> vector<8x128xf32>
    %26 = arith.addf %8, %25 : vector<8x128xf32>
    %27 = vector.extract_strided_slice %5 {offsets = [0, 128], sizes = [8, 128], strides = [1, 1]} : vector<16x1536xf32> to vector<8x128xf32>
    %28 = vector.extract_strided_slice %5 {offsets = [0, 640], sizes = [8, 128], strides = [1, 1]} : vector<16x1536xf32> to vector<8x128xf32>
    %29 = vector.extract_strided_slice %5 {offsets = [0, 1152], sizes = [8, 128], strides = [1, 1]} : vector<16x1536xf32> to vector<8x128xf32>
    %cst_14 = arith.constant dense<0.000000e+00> : vector<8x8xf32>
    %30 = tpu.matmul %27, %28, %cst_14 {dimension_numbers = #tpu.dot_dimension_numbers<[1], [1], [0], [0], [0, 0, 1, 0], [], []>} : vector<8x128xf32>, vector<8x128xf32>, vector<8x8xf32> -> vector<8x8xf32>
    %cst_15 = arith.constant dense<0xFF800000> : vector<8xf32>
    %31 = vector.multi_reduction <maximumf>, %30, %cst_15 [1] : vector<8x8xf32> to vector<8xf32>
    %32 = vector.shape_cast %31 : vector<8xf32> to vector<8x1xf32>
    %33 = vector.broadcast %32 : vector<8x1xf32> to vector<8x8xf32>
    %34 = arith.subf %30, %33 : vector<8x8xf32>
    %35 = math.exp %34 : vector<8x8xf32>
    %cst_16 = arith.constant dense<0.000000e+00> : vector<8xf32>
    %36 = vector.multi_reduction <add>, %35, %cst_16 [1] : vector<8x8xf32> to vector<8xf32>
    %37 = vector.shape_cast %36 : vector<8xf32> to vector<8x1xf32>
    %38 = tpu.reciprocal %37 {approx = true} : vector<8x1xf32> -> vector<8x1xf32>
    %39 = vector.broadcast %38 : vector<8x1xf32> to vector<8x8xf32>
    %40 = arith.mulf %35, %39 : vector<8x8xf32>
    %cst_17 = arith.constant dense<0.000000e+00> : vector<8x128xf32>
    %41 = tpu.matmul %40, %29, %cst_17 {dimension_numbers = #tpu.dot_dimension_numbers<[1], [0], [0], [1], [0, 0, 1, 1], [], []>} : vector<8x8xf32>, vector<8x128xf32>, vector<8x128xf32> -> vector<8x128xf32>
    %c128 = arith.constant 128 : index
    %c0_18 = arith.constant 0 : index
    %42 = vector.load %arg4[%c128, %c0_18] : memref<512x128xf32, #tpu.memory_space<vmem>>, vector<128x128xf32>
    %cst_19 = arith.constant dense<0.000000e+00> : vector<8x128xf32>
    %43 = tpu.matmul %41, %42, %cst_19 {dimension_numbers = #tpu.dot_dimension_numbers<[1], [0], [0], [1], [0, 0, 1, 1], [], []>} : vector<8x128xf32>, vector<128x128xf32>, vector<8x128xf32> -> vector<8x128xf32>
    %44 = arith.addf %26, %43 : vector<8x128xf32>
    %45 = vector.extract_strided_slice %5 {offsets = [0, 256], sizes = [8, 128], strides = [1, 1]} : vector<16x1536xf32> to vector<8x128xf32>
    %46 = vector.extract_strided_slice %5 {offsets = [0, 768], sizes = [8, 128], strides = [1, 1]} : vector<16x1536xf32> to vector<8x128xf32>
    %47 = vector.extract_strided_slice %5 {offsets = [0, 1280], sizes = [8, 128], strides = [1, 1]} : vector<16x1536xf32> to vector<8x128xf32>
    %cst_20 = arith.constant dense<0.000000e+00> : vector<8x8xf32>
    %48 = tpu.matmul %45, %46, %cst_20 {dimension_numbers = #tpu.dot_dimension_numbers<[1], [1], [0], [0], [0, 0, 1, 0], [], []>} : vector<8x128xf32>, vector<8x128xf32>, vector<8x8xf32> -> vector<8x8xf32>
    %cst_21 = arith.constant dense<0xFF800000> : vector<8xf32>
    %49 = vector.multi_reduction <maximumf>, %48, %cst_21 [1] : vector<8x8xf32> to vector<8xf32>
    %50 = vector.shape_cast %49 : vector<8xf32> to vector<8x1xf32>
    %51 = vector.broadcast %50 : vector<8x1xf32> to vector<8x8xf32>
    %52 = arith.subf %48, %51 : vector<8x8xf32>
    %53 = math.exp %52 : vector<8x8xf32>
    %cst_22 = arith.constant dense<0.000000e+00> : vector<8xf32>
    %54 = vector.multi_reduction <add>, %53, %cst_22 [1] : vector<8x8xf32> to vector<8xf32>
    %55 = vector.shape_cast %54 : vector<8xf32> to vector<8x1xf32>
    %56 = tpu.reciprocal %55 {approx = true} : vector<8x1xf32> -> vector<8x1xf32>
    %57 = vector.broadcast %56 : vector<8x1xf32> to vector<8x8xf32>
    %58 = arith.mulf %53, %57 : vector<8x8xf32>
    %cst_23 = arith.constant dense<0.000000e+00> : vector<8x128xf32>
    %59 = tpu.matmul %58, %47, %cst_23 {dimension_numbers = #tpu.dot_dimension_numbers<[1], [0], [0], [1], [0, 0, 1, 1], [], []>} : vector<8x8xf32>, vector<8x128xf32>, vector<8x128xf32> -> vector<8x128xf32>
    %c256 = arith.constant 256 : index
    %c0_24 = arith.constant 0 : index
    %60 = vector.load %arg4[%c256, %c0_24] : memref<512x128xf32, #tpu.memory_space<vmem>>, vector<128x128xf32>
    %cst_25 = arith.constant dense<0.000000e+00> : vector<8x128xf32>
    %61 = tpu.matmul %59, %60, %cst_25 {dimension_numbers = #tpu.dot_dimension_numbers<[1], [0], [0], [1], [0, 0, 1, 1], [], []>} : vector<8x128xf32>, vector<128x128xf32>, vector<8x128xf32> -> vector<8x128xf32>
    %62 = arith.addf %44, %61 : vector<8x128xf32>
    %63 = vector.extract_strided_slice %5 {offsets = [0, 384], sizes = [8, 128], strides = [1, 1]} : vector<16x1536xf32> to vector<8x128xf32>
    %64 = vector.extract_strided_slice %5 {offsets = [0, 896], sizes = [8, 128], strides = [1, 1]} : vector<16x1536xf32> to vector<8x128xf32>
    %65 = vector.extract_strided_slice %5 {offsets = [0, 1408], sizes = [8, 128], strides = [1, 1]} : vector<16x1536xf32> to vector<8x128xf32>
    %cst_26 = arith.constant dense<0.000000e+00> : vector<8x8xf32>
    %66 = tpu.matmul %63, %64, %cst_26 {dimension_numbers = #tpu.dot_dimension_numbers<[1], [1], [0], [0], [0, 0, 1, 0], [], []>} : vector<8x128xf32>, vector<8x128xf32>, vector<8x8xf32> -> vector<8x8xf32>
    %cst_27 = arith.constant dense<0xFF800000> : vector<8xf32>
    %67 = vector.multi_reduction <maximumf>, %66, %cst_27 [1] : vector<8x8xf32> to vector<8xf32>
    %68 = vector.shape_cast %67 : vector<8xf32> to vector<8x1xf32>
    %69 = vector.broadcast %68 : vector<8x1xf32> to vector<8x8xf32>
    %70 = arith.subf %66, %69 : vector<8x8xf32>
    %71 = math.exp %70 : vector<8x8xf32>
    %cst_28 = arith.constant dense<0.000000e+00> : vector<8xf32>
    %72 = vector.multi_reduction <add>, %71, %cst_28 [1] : vector<8x8xf32> to vector<8xf32>
    %73 = vector.shape_cast %72 : vector<8xf32> to vector<8x1xf32>
    %74 = tpu.reciprocal %73 {approx = true} : vector<8x1xf32> -> vector<8x1xf32>
    %75 = vector.broadcast %74 : vector<8x1xf32> to vector<8x8xf32>
    %76 = arith.mulf %71, %75 : vector<8x8xf32>
    %cst_29 = arith.constant dense<0.000000e+00> : vector<8x128xf32>
    %77 = tpu.matmul %76, %65, %cst_29 {dimension_numbers = #tpu.dot_dimension_numbers<[1], [0], [0], [1], [0, 0, 1, 1], [], []>} : vector<8x8xf32>, vector<8x128xf32>, vector<8x128xf32> -> vector<8x128xf32>
    %c384 = arith.constant 384 : index
    %c0_30 = arith.constant 0 : index
    %78 = vector.load %arg4[%c384, %c0_30] : memref<512x128xf32, #tpu.memory_space<vmem>>, vector<128x128xf32>
    %cst_31 = arith.constant dense<0.000000e+00> : vector<8x128xf32>
    %79 = tpu.matmul %77, %78, %cst_31 {dimension_numbers = #tpu.dot_dimension_numbers<[1], [0], [0], [1], [0, 0, 1, 1], [], []>} : vector<8x128xf32>, vector<128x128xf32>, vector<8x128xf32> -> vector<8x128xf32>
    %80 = arith.addf %62, %79 : vector<8x128xf32>
    %c0_32 = arith.constant 0 : index
    %c0_33 = arith.constant 0 : index
    %81 = vector.load %arg6[%c0_32, %c0_33] : memref<16x128xf32, #tpu.memory_space<vmem>>, vector<8x128xf32>
    tpu.vector_store %arg6[%c0_32, %c0_33], %80 {strides = array<i32>} : memref<16x128xf32, #tpu.memory_space<vmem>>, vector<8x128xf32>,
    %82 = vector.extract_strided_slice %5 {offsets = [8, 0], sizes = [8, 128], strides = [1, 1]} : vector<16x1536xf32> to vector<8x128xf32>
    %83 = vector.extract_strided_slice %5 {offsets = [8, 512], sizes = [8, 128], strides = [1, 1]} : vector<16x1536xf32> to vector<8x128xf32>
    %84 = vector.extract_strided_slice %5 {offsets = [8, 1024], sizes = [8, 128], strides = [1, 1]} : vector<16x1536xf32> to vector<8x128xf32>
    %cst_34 = arith.constant dense<0.000000e+00> : vector<8x8xf32>
    %85 = tpu.matmul %82, %83, %cst_34 {dimension_numbers = #tpu.dot_dimension_numbers<[1], [1], [0], [0], [0, 0, 1, 0], [], []>} : vector<8x128xf32>, vector<8x128xf32>, vector<8x8xf32> -> vector<8x8xf32>
    %cst_35 = arith.constant dense<0xFF800000> : vector<8xf32>
    %86 = vector.multi_reduction <maximumf>, %85, %cst_35 [1] : vector<8x8xf32> to vector<8xf32>
    %87 = vector.shape_cast %86 : vector<8xf32> to vector<8x1xf32>
    %88 = vector.broadcast %87 : vector<8x1xf32> to vector<8x8xf32>
    %89 = arith.subf %85, %88 : vector<8x8xf32>
    %90 = math.exp %89 : vector<8x8xf32>
    %cst_36 = arith.constant dense<0.000000e+00> : vector<8xf32>
    %91 = vector.multi_reduction <add>, %90, %cst_36 [1] : vector<8x8xf32> to vector<8xf32>
    %92 = vector.shape_cast %91 : vector<8xf32> to vector<8x1xf32>
    %93 = tpu.reciprocal %92 {approx = true} : vector<8x1xf32> -> vector<8x1xf32>
    %94 = vector.broadcast %93 : vector<8x1xf32> to vector<8x8xf32>
    %95 = arith.mulf %90, %94 : vector<8x8xf32>
    %cst_37 = arith.constant dense<0.000000e+00> : vector<8x128xf32>
    %96 = tpu.matmul %95, %84, %cst_37 {dimension_numbers = #tpu.dot_dimension_numbers<[1], [0], [0], [1], [0, 0, 1, 1], [], []>} : vector<8x8xf32>, vector<8x128xf32>, vector<8x128xf32> -> vector<8x128xf32>
    %c0_38 = arith.constant 0 : index
    %c0_39 = arith.constant 0 : index
    %97 = vector.load %arg4[%c0_38, %c0_39] : memref<512x128xf32, #tpu.memory_space<vmem>>, vector<128x128xf32>
    %cst_40 = arith.constant dense<0.000000e+00> : vector<8x128xf32>
    %98 = tpu.matmul %96, %97, %cst_40 {dimension_numbers = #tpu.dot_dimension_numbers<[1], [0], [0], [1], [0, 0, 1, 1], [], []>} : vector<8x128xf32>, vector<128x128xf32>, vector<8x128xf32> -> vector<8x128xf32>
    %99 = arith.addf %8, %98 : vector<8x128xf32>
    %100 = vector.extract_strided_slice %5 {offsets = [8, 128], sizes = [8, 128], strides = [1, 1]} : vector<16x1536xf32> to vector<8x128xf32>
    %101 = vector.extract_strided_slice %5 {offsets = [8, 640], sizes = [8, 128], strides = [1, 1]} : vector<16x1536xf32> to vector<8x128xf32>
    %102 = vector.extract_strided_slice %5 {offsets = [8, 1152], sizes = [8, 128], strides = [1, 1]} : vector<16x1536xf32> to vector<8x128xf32>
    %cst_41 = arith.constant dense<0.000000e+00> : vector<8x8xf32>
    %103 = tpu.matmul %100, %101, %cst_41 {dimension_numbers = #tpu.dot_dimension_numbers<[1], [1], [0], [0], [0, 0, 1, 0], [], []>} : vector<8x128xf32>, vector<8x128xf32>, vector<8x8xf32> -> vector<8x8xf32>
    %cst_42 = arith.constant dense<0xFF800000> : vector<8xf32>
    %104 = vector.multi_reduction <maximumf>, %103, %cst_42 [1] : vector<8x8xf32> to vector<8xf32>
    %105 = vector.shape_cast %104 : vector<8xf32> to vector<8x1xf32>
    %106 = vector.broadcast %105 : vector<8x1xf32> to vector<8x8xf32>
    %107 = arith.subf %103, %106 : vector<8x8xf32>
    %108 = math.exp %107 : vector<8x8xf32>
    %cst_43 = arith.constant dense<0.000000e+00> : vector<8xf32>
    %109 = vector.multi_reduction <add>, %108, %cst_43 [1] : vector<8x8xf32> to vector<8xf32>
    %110 = vector.shape_cast %109 : vector<8xf32> to vector<8x1xf32>
    %111 = tpu.reciprocal %110 {approx = true} : vector<8x1xf32> -> vector<8x1xf32>
    %112 = vector.broadcast %111 : vector<8x1xf32> to vector<8x8xf32>
    %113 = arith.mulf %108, %112 : vector<8x8xf32>
    %cst_44 = arith.constant dense<0.000000e+00> : vector<8x128xf32>
    %114 = tpu.matmul %113, %102, %cst_44 {dimension_numbers = #tpu.dot_dimension_numbers<[1], [0], [0], [1], [0, 0, 1, 1], [], []>} : vector<8x8xf32>, vector<8x128xf32>, vector<8x128xf32> -> vector<8x128xf32>
    %c128_45 = arith.constant 128 : index
    %c0_46 = arith.constant 0 : index
    %115 = vector.load %arg4[%c128_45, %c0_46] : memref<512x128xf32, #tpu.memory_space<vmem>>, vector<128x128xf32>
    %cst_47 = arith.constant dense<0.000000e+00> : vector<8x128xf32>
    %116 = tpu.matmul %114, %115, %cst_47 {dimension_numbers = #tpu.dot_dimension_numbers<[1], [0], [0], [1], [0, 0, 1, 1], [], []>} : vector<8x128xf32>, vector<128x128xf32>, vector<8x128xf32> -> vector<8x128xf32>
    %117 = arith.addf %99, %116 : vector<8x128xf32>
    %118 = vector.extract_strided_slice %5 {offsets = [8, 256], sizes = [8, 128], strides = [1, 1]} : vector<16x1536xf32> to vector<8x128xf32>
    %119 = vector.extract_strided_slice %5 {offsets = [8, 768], sizes = [8, 128], strides = [1, 1]} : vector<16x1536xf32> to vector<8x128xf32>
    %120 = vector.extract_strided_slice %5 {offsets = [8, 1280], sizes = [8, 128], strides = [1, 1]} : vector<16x1536xf32> to vector<8x128xf32>
    %cst_48 = arith.constant dense<0.000000e+00> : vector<8x8xf32>
    %121 = tpu.matmul %118, %119, %cst_48 {dimension_numbers = #tpu.dot_dimension_numbers<[1], [1], [0], [0], [0, 0, 1, 0], [], []>} : vector<8x128xf32>, vector<8x128xf32>, vector<8x8xf32> -> vector<8x8xf32>
    %cst_49 = arith.constant dense<0xFF800000> : vector<8xf32>
    %122 = vector.multi_reduction <maximumf>, %121, %cst_49 [1] : vector<8x8xf32> to vector<8xf32>
    %123 = vector.shape_cast %122 : vector<8xf32> to vector<8x1xf32>
    %124 = vector.broadcast %123 : vector<8x1xf32> to vector<8x8xf32>
    %125 = arith.subf %121, %124 : vector<8x8xf32>
    %126 = math.exp %125 : vector<8x8xf32>
    %cst_50 = arith.constant dense<0.000000e+00> : vector<8xf32>
    %127 = vector.multi_reduction <add>, %126, %cst_50 [1] : vector<8x8xf32> to vector<8xf32>
    %128 = vector.shape_cast %127 : vector<8xf32> to vector<8x1xf32>
    %129 = tpu.reciprocal %128 {approx = true} : vector<8x1xf32> -> vector<8x1xf32>
    %130 = vector.broadcast %129 : vector<8x1xf32> to vector<8x8xf32>
    %131 = arith.mulf %126, %130 : vector<8x8xf32>
    %cst_51 = arith.constant dense<0.000000e+00> : vector<8x128xf32>
    %132 = tpu.matmul %131, %120, %cst_51 {dimension_numbers = #tpu.dot_dimension_numbers<[1], [0], [0], [1], [0, 0, 1, 1], [], []>} : vector<8x8xf32>, vector<8x128xf32>, vector<8x128xf32> -> vector<8x128xf32>
    %c256_52 = arith.constant 256 : index
    %c0_53 = arith.constant 0 : index
    %133 = vector.load %arg4[%c256_52, %c0_53] : memref<512x128xf32, #tpu.memory_space<vmem>>, vector<128x128xf32>
    %cst_54 = arith.constant dense<0.000000e+00> : vector<8x128xf32>
    %134 = tpu.matmul %132, %133, %cst_54 {dimension_numbers = #tpu.dot_dimension_numbers<[1], [0], [0], [1], [0, 0, 1, 1], [], []>} : vector<8x128xf32>, vector<128x128xf32>, vector<8x128xf32> -> vector<8x128xf32>
    %135 = arith.addf %117, %134 : vector<8x128xf32>
    %136 = vector.extract_strided_slice %5 {offsets = [8, 384], sizes = [8, 128], strides = [1, 1]} : vector<16x1536xf32> to vector<8x128xf32>
    %137 = vector.extract_strided_slice %5 {offsets = [8, 896], sizes = [8, 128], strides = [1, 1]} : vector<16x1536xf32> to vector<8x128xf32>
    %138 = vector.extract_strided_slice %5 {offsets = [8, 1408], sizes = [8, 128], strides = [1, 1]} : vector<16x1536xf32> to vector<8x128xf32>
    %cst_55 = arith.constant dense<0.000000e+00> : vector<8x8xf32>
    %139 = tpu.matmul %136, %137, %cst_55 {dimension_numbers = #tpu.dot_dimension_numbers<[1], [1], [0], [0], [0, 0, 1, 0], [], []>} : vector<8x128xf32>, vector<8x128xf32>, vector<8x8xf32> -> vector<8x8xf32>
    %cst_56 = arith.constant dense<0xFF800000> : vector<8xf32>
    %140 = vector.multi_reduction <maximumf>, %139, %cst_56 [1] : vector<8x8xf32> to vector<8xf32>
    %141 = vector.shape_cast %140 : vector<8xf32> to vector<8x1xf32>
    %142 = vector.broadcast %141 : vector<8x1xf32> to vector<8x8xf32>
    %143 = arith.subf %139, %142 : vector<8x8xf32>
    %144 = math.exp %143 : vector<8x8xf32>
    %cst_57 = arith.constant dense<0.000000e+00> : vector<8xf32>
    %145 = vector.multi_reduction <add>, %144, %cst_57 [1] : vector<8x8xf32> to vector<8xf32>
    %146 = vector.shape_cast %145 : vector<8xf32> to vector<8x1xf32>
    %147 = tpu.reciprocal %146 {approx = true} : vector<8x1xf32> -> vector<8x1xf32>
    %148 = vector.broadcast %147 : vector<8x1xf32> to vector<8x8xf32>
    %149 = arith.mulf %144, %148 : vector<8x8xf32>
    %cst_58 = arith.constant dense<0.000000e+00> : vector<8x128xf32>
    %150 = tpu.matmul %149, %138, %cst_58 {dimension_numbers = #tpu.dot_dimension_numbers<[1], [0], [0], [1], [0, 0, 1, 1], [], []>} : vector<8x8xf32>, vector<8x128xf32>, vector<8x128xf32> -> vector<8x128xf32>
    %c384_59 = arith.constant 384 : index
    %c0_60 = arith.constant 0 : index
    %151 = vector.load %arg4[%c384_59, %c0_60] : memref<512x128xf32, #tpu.memory_space<vmem>>, vector<128x128xf32>
    %cst_61 = arith.constant dense<0.000000e+00> : vector<8x128xf32>
    %152 = tpu.matmul %150, %151, %cst_61 {dimension_numbers = #tpu.dot_dimension_numbers<[1], [0], [0], [1], [0, 0, 1, 1], [], []>} : vector<8x128xf32>, vector<128x128xf32>, vector<8x128xf32> -> vector<8x128xf32>
    %153 = arith.addf %135, %152 : vector<8x128xf32>
    %c8 = arith.constant 8 : index
    %c0_62 = arith.constant 0 : index
    %154 = vector.load %arg6[%c8, %c0_62] : memref<16x128xf32, #tpu.memory_space<vmem>>, vector<8x128xf32>
    tpu.vector_store %arg6[%c8, %c0_62], %153 {strides = array<i32>} : memref<16x128xf32, #tpu.memory_space<vmem>>, vector<8x128xf32>,
    return
  }
  func.func @transform_0(%arg0: i32) -> (i32, i32) {
    %c0_i32 = arith.constant 0 : i32
    %c0_i32_0 = arith.constant 0 : i32
    return %arg0, %c0_i32 : i32, i32
  }
  func.func @transform_1(%arg0: i32) -> (i32, i32) {
    %c0_i32 = arith.constant 0 : i32
    %c0_i32_0 = arith.constant 0 : i32
    %c0_i32_1 = arith.constant 0 : i32
    return %c0_i32, %c0_i32_0 : i32, i32
  }
  func.func @transform_2(%arg0: i32) -> (i32, i32) {
    %c0_i32 = arith.constant 0 : i32
    %c0_i32_0 = arith.constant 0 : i32
    %c0_i32_1 = arith.constant 0 : i32
    return %c0_i32, %c0_i32_0 : i32, i32
  }
  func.func @transform_3(%arg0: i32) -> (i32, i32) {
    %c0_i32 = arith.constant 0 : i32
    %c0_i32_0 = arith.constant 0 : i32
    %c0_i32_1 = arith.constant 0 : i32
    return %c0_i32, %c0_i32_0 : i32, i32
  }
  func.func @transform_4(%arg0: i32) -> (i32, i32) {
    %c0_i32 = arith.constant 0 : i32
    %c0_i32_0 = arith.constant 0 : i32
    %c0_i32_1 = arith.constant 0 : i32
    return %c0_i32, %c0_i32_0 : i32, i32
  }
  func.func @transform_5(%arg0: i32) -> (i32, i32) {
    %c0_i32 = arith.constant 0 : i32
    %c0_i32_0 = arith.constant 0 : i32
    return %arg0, %c0_i32 : i32, i32
  }
}

</mosaic_0001>

<bundles_post_ra>
// kernel: tpu_custom_call.1
= control target key start
LH: loop header
LB: loop body
LE: loop exit
PB: predicated region body
PF: predicated region fallthrough
CT: control target
= control target key end

     0   :  { %10 = vsyncpa [#allocation3], 0  ;;  %s4151_s0 = inlined_call_operand.hbm [shape: f32[16,32], index: 0, kind: input, shape index: {}]   ;;  %s4152_s1 = inlined_call_operand.hbm [shape: f32[32,1536], index: 1, kind: input, shape index: {}]   ;;  %s4153_s2 = inlined_call_operand.hbm [shape: f32[1,1536], index: 2, kind: input, shape index: {}]   ;;  %s4154_s3 = inlined_call_operand.hbm [shape: f32[512,128], index: 3, kind: input, shape index: {}]   ;;  %s4155_s4 = inlined_call_operand.vmem [shape: f32[1,128], index: 4, kind: input, shape index: {}]   ;;  %s4156_s5 = inlined_call_operand.hbm [shape: f32[16,128], index: 5, kind: output, shape index: {}]  }
   0x1   :  { %11 = vsyncpa [#allocation6], 0 }
   0x2   :  { %12 = vsyncpa [#allocation9], 0 }
   0x3   :  { %13 = vsyncpa [#allocation4], 0  ;;  %s3583_s18 = smov [#allocation5]   ;;  %s3465_s22 = scalar_lea.hbm %s4152_s1, 6144 }
   0x4   :  { %s31_s19 = sshll.u32 %s3583_s18, 4  ;;  %p3466_p0 = scmp.ne.s32.totalorder %s4152_s1, %s3465_s22  ;;  %s32_s19 = int_to_ptr.vmem [resolvable:$true] %s31_s19 }
   0x5   :  { %p3469_p1 = scmp.lt.u32.totalorder %s3465_s22, %s4152_s1 }
   0x7   :  { %p3471_p2 = pnand %p3469_p1, %p3466_p0 }
   0x9   :  { %3474 = shalt.err (!%p3471_p2)
}
   0xa   :  { %s3475_s27 = scalar_lea.vmem %s32_s19, 6144  ;;  %p3480_p4 = scmp.lt.s32.totalorder %s32_s19, %s32_s19 }
   0xb   :  { %p3476_p3 = scmp.ne.s32.totalorder %s32_s19, %s3475_s27  ;;  %p3481_p5 = scmp.lt.s32.totalorder %s3475_s27, %s3475_s27 }
   0xd   :  { %p3482_p6 = por %p3481_p5, %p3480_p4 }
   0xf   :  { %p3483_p7 = pnand %p3482_p6, %p3476_p3 }
  0x11   :  { %3486 = shalt.err (!%p3483_p7)
}
  0x12   :  { %s3584_s28 = smov 1536   ;;  %s3585_s29 = smov 96  }
  0x13   :  { %37 = dma.hbm_to_vmem [thread:$0]  %s4152_s1, 6144, %s32_s19, [#allocation6], %s3584_s28, %s3584_s28, %s3585_s29  }
  0x14   :  { %s3586_s7 = smov [#allocation2]   ;;  %s3487_s11 = scalar_lea.hbm %s4151_s0, 256 }
  0x15   :  { %s19_s8 = sshll.u32 %s3586_s7, 4  ;;  %p3488_p8 = scmp.ne.s32.totalorder %s4151_s0, %s3487_s11  ;;  %s20_s8 = int_to_ptr.vmem [resolvable:$true] %s19_s8 }
  0x16   :  { %p3491_p9 = scmp.lt.u32.totalorder %s3487_s11, %s4151_s0 }
  0x18   :  { %p3493_p10 = pnand %p3491_p9, %p3488_p8 }
  0x1a   :  { %3496 = shalt.err (!%p3493_p10)
}
  0x1b   :  { %s3497_s16 = scalar_lea.vmem %s20_s8, 256  ;;  %p3502_p12 = scmp.lt.s32.totalorder %s20_s8, %s20_s8 }
  0x1c   :  { %p3498_p11 = scmp.ne.s32.totalorder %s20_s8, %s3497_s16  ;;  %p3503_p13 = scmp.lt.s32.totalorder %s3497_s16, %s3497_s16 }
  0x1e   :  { %p3504_p0 = por %p3503_p13, %p3502_p12 }
  0x20   :  { %p3505_p1 = pnand %p3504_p0, %p3498_p11 }
  0x22   :  { %3508 = shalt.err (!%p3505_p1)
}
  0x23   :  { %s3587_s1 = smov 128   ;;  %s3588_s17 = smov 8  }
  0x24   :  { %25 = dma.hbm_to_vmem [thread:$0]  %s4151_s0, 256, %s20_s8, [#allocation3], %s3587_s1, %s3587_s1, %s3588_s17  }
  0x25   :  { %s3589_s20 = smov [#allocation7]   ;;  %s3590_s22 = smov [#allocation8]  }
  0x26   :  { %s44_s21 = sshll.u32 %s3589_s20, 4  ;;  %s53_s23 = sshll.u32 %s3590_s22, 4  ;;  %s45_s21 = int_to_ptr.vmem [resolvable:$true] %s44_s21  ;;  %s3652_s23 = int_to_ptr.vmem [resolvable:$true] %s53_s23 }
  0x27   :  { %s3509_s26 = scalar_lea.hbm %s4153_s2, 192 }
  0x28   :  { %p3510_p2 = scmp.ne.s32.totalorder %s4153_s2, %s3509_s26  ;;  %p3513_p3 = scmp.lt.u32.totalorder %s3509_s26, %s4153_s2 }
  0x2a   :  { %p3515_p4 = pnand %p3513_p3, %p3510_p2 }
  0x2c   :  { %3518 = shalt.err (!%p3515_p4)
}
  0x2d   :  { %s3519_s0 = scalar_lea.vmem %s45_s21, 192  ;;  %p3524_p6 = scmp.lt.s32.totalorder %s45_s21, %s45_s21 }
  0x2e   :  { %p3520_p5 = scmp.ne.s32.totalorder %s45_s21, %s3519_s0  ;;  %p3525_p7 = scmp.lt.s32.totalorder %s3519_s0, %s3519_s0 }
  0x30   :  { %p3526_p8 = por %p3525_p7, %p3524_p6 }
  0x32   :  { %p3527_p9 = pnand %p3526_p8, %p3520_p5 }
  0x34   :  { %3530 = shalt.err (!%p3527_p9)
}
  0x35   :  { %47 = dma.hbm_to_vmem [thread:$0]  %s4153_s2, 192, %s45_s21, [#allocation6]  }
  0x36   :  { %s3531_s10 = scalar_lea.hbm %s4154_s3, 8192 }
  0x37   :  { %p3532_p10 = scmp.ne.s32.totalorder %s4154_s3, %s3531_s10  ;;  %p3535_p11 = scmp.lt.u32.totalorder %s3531_s10, %s4154_s3 }
  0x39   :  { %p3537_p12 = pnand %p3535_p11, %p3532_p10 }
  0x3b   :  { %3540 = shalt.err (!%p3537_p12)
}
  0x3c   :  { %s3541_s15 = scalar_lea.vmem %s3652_s23, 8192  ;;  %p3546_p0 = scmp.lt.s32.totalorder %s3652_s23, %s3652_s23 }
  0x3d   :  { %p3542_p13 = scmp.ne.s32.totalorder %s3652_s23, %s3541_s15  ;;  %p3547_p1 = scmp.lt.s32.totalorder %s3541_s15, %s3541_s15 }
  0x3f   :  { %p3548_p2 = por %p3547_p1, %p3546_p0 }
  0x41   :  { %p3549_p3 = pnand %p3548_p2, %p3542_p13 }
  0x43   :  { %3552 = shalt.err (!%p3549_p3)
}
  0x44   :  { %59 = dma.hbm_to_vmem [thread:$0]  %s4154_s3, 8192, %s3652_s23, [#allocation9], %s3587_s1, %s3587_s1, %s3588_s17  }
  0x45   :  { %3575 = dma.done.wait [#allocation3], 256  }
  0x46   :  { %3576 = vsyncadd [#allocation3], 4294967040 }
  0x47   :  { %3577 = dma.done.wait [#allocation6], 6336  }
  0x48   :  { %3578 = vsyncadd [#allocation6], 4294960960 }
  0x49   :  { %3579 = dma.done.wait [#allocation9], 8192  }
  0x4a   :  { %3580 = vsyncadd [#allocation9], 4294959104  ;;  %v3591_v0 = vmov 0.0   ;;  %v77_v1 = vld [vmem:[#allocation5 + $0x8] sm:$0xff]  ;;  %v76_v3 = vld [vmem:[#allocation5] sm:$0xff]  ;;  %vm188_vm0 = vcmask 261120  }
  0x4b   :  { %259 = vmatprep.mubr.f32.mxu0 %v3591_v0  ;;  %650 = vmatprep.mubr.f32.mxu1 %v3591_v0  ;;  %v89_v2 = vld [vmem:[#allocation5 + $0x68] sm:$0xff]  ;;  %v88_v5 = vld [vmem:[#allocation5 + $0x60] sm:$0xff]  ;;  %v79_v12 = vld [vmem:[#allocation5 + $0x18] sm:$0xff]  ;;  %vm3592_vm1 = vmmov 0   ;;  %vm734_vm2 = vcmask 64512  }
  0x4c   :  { %v3163_v4 = vpack.c.bf16 %v89_v2, %v77_v1  ;;  %v101_v6 = vld [vmem:[#allocation5 + $0xc8] sm:$0xff]  ;;  %v3165_v8 = vpack.c.bf16 %v88_v5, %v76_v3  ;;  %v100_v10 = vld [vmem:[#allocation5 + $0xc0] sm:$0xff]  ;;  %v91_v13 = vld [vmem:[#allocation5 + $0x78] sm:$0xff] }
  0x4d   :  { %v113_v7 = vld [vmem:[#allocation5 + $0x128] sm:$0xff]  ;;  %v112_v11 = vld [vmem:[#allocation5 + $0x120] sm:$0xff]  ;;  %v3171_v15 = vpack.c.bf16 %v91_v13, %v79_v12  ;;  %v78_v16 = vld [vmem:[#allocation5 + $0x10] sm:$0xff]  ;;  %v128_v12 = vlaneseq }
  0x4e   :  { %v3167_v9 = vpack.c.bf16 %v113_v7, %v101_v6  ;;  %3164 = vmatprep.subr.bf16.mxu0 %v3163_v4  ;;  %v3169_v14 = vpack.c.bf16 %v112_v11, %v100_v10  ;;  %v90_v17 = vld [vmem:[#allocation5 + $0x70] sm:$0xff]  ;;  %v103_v18 = vld [vmem:[#allocation5 + $0xd8] sm:$0xff]  ;;  %v81_v25 = vld [vmem:[#allocation5 + $0x28] sm:$0xff] }
  0x4f   :  { %3166 = vmatpush1.bf16.msra.mxu0 %v3165_v8  ;;  %v115_v19 = vld [vmem:[#allocation5 + $0x138] sm:$0xff]  ;;  %v3688_v20 = vld [vmem:[#allocation2] sm:$0xff]  ;;  %v3173_v21 = vpack.c.bf16 %v90_v17, %v78_v16  ;;  %v93_v26 = vld [vmem:[#allocation5 + $0x88] sm:$0xff]  ;;  %v3732_v13 = vshrl.u32 %v128_v12, 7 }
  0x50   :  { %3168 = vmatprep.subr.bf16.mxu0 %v3167_v9  ;;  %v3175_v22 = vpack.c.bf16 %v115_v19, %v103_v18  ;;  %v102_v23 = vld [vmem:[#allocation5 + $0xd0] sm:$0xff]  ;;  %v3693_v27 = vld [vmem:[#allocation2 + $0x8] sm:$0xff]  ;;  %v3179_v29 = vpack.c.bf16 %v93_v26, %v81_v25  ;;  %v80_v30 = vld [vmem:[#allocation5 + $0x20] sm:$0xff] }
  0x51   :  { %v114_v24 = vld [vmem:[#allocation5 + $0x130] sm:$0xff]  ;;  %v92_v31 = vld [vmem:[#allocation5 + $0x80] sm:$0xff]  ;;  %v105_v32 = vld [vmem:[#allocation5 + $0xe8] sm:$0xff]  ;;  %v134_v17 = vsub.s32 1, %v3732_v13  ;;  %v138_v25 = vsub.s32 2, %v3732_v13 }
  0x52   :  { %v3177_v28 = vpack.c.bf16 %v114_v24, %v102_v23  ;;  %v117_v33 = vld [vmem:[#allocation5 + $0x148] sm:$0xff]  ;;  %v3181_v34 = vpack.c.bf16 %v92_v31, %v80_v30  ;;  %v104_v36 = vld [vmem:[#allocation5 + $0xe0] sm:$0xff]  ;;  %v83_v38 = vld [vmem:[#allocation5 + $0x38] sm:$0xff] }
  0x53   :  { %3170 = vmatpush1.bf16.msra.mxu0 %v3169_v14  ;;  %v3183_v35 = vpack.c.bf16 %v117_v33, %v105_v32  ;;  %v116_v37 = vld [vmem:[#allocation5 + $0x140] sm:$0xff]  ;;  %v95_v39 = vld [vmem:[#allocation5 + $0x98] sm:$0xff]  ;;  %v82_v42 = vld [vmem:[#allocation5 + $0x30] sm:$0xff]  ;;  %v130_v14 = vsub.s32 0, %v3732_v13 }
  0x54   :  { %3172 = vmatprep.subr.bf16.mxu0 %v3171_v15  ;;  %v3185_v40 = vpack.c.bf16 %v116_v37, %v104_v36  ;;  %v3187_v41 = vpack.c.bf16 %v95_v39, %v83_v38  ;;  %v94_v43 = vld [vmem:[#allocation5 + $0x90] sm:$0xff]  ;;  %v107_v44 = vld [vmem:[#allocation5 + $0xf8] sm:$0xff]  ;;  %v85_v50 = vld [vmem:[#allocation5 + $0x48] sm:$0xff]  ;;  %v150_v38 = vsub.s32 5, %v3732_v13 }
  0x55   :  { %v119_v45 = vld [vmem:[#allocation5 + $0x158] sm:$0xff]  ;;  %v3189_v46 = vpack.c.bf16 %v94_v43, %v82_v42  ;;  %v106_v48 = vld [vmem:[#allocation5 + $0xf0] sm:$0xff]  ;;  %v97_v51 = vld [vmem:[#allocation5 + $0xa8] sm:$0xff] }
  0x56   :  { %2614 = vmatmul.mubr.msk.f32.vlgmr.msra.gmra.mrb[0].mxu0 %vm188_vm0, %v3688_v20  ;;  %v3191_v47 = vpack.c.bf16 %v119_v45, %v107_v44  ;;  %v118_v49 = vld [vmem:[#allocation5 + $0x150] sm:$0xff]  ;;  %v3195_v53 = vpack.c.bf16 %v97_v51, %v85_v50  ;;  %v84_v54 = vld [vmem:[#allocation5 + $0x40] sm:$0xff]  ;;  %v109_v57 = vld [vmem:[#allocation5 + $0x108] sm:$0xff] }
  0x57   :  { %3174 = vmatpush1.bf16.msra.mxu0 %v3173_v21  ;;  %265 = vmatprep.mubr.f32.mxu0 %v3591_v0  ;;  %v3193_v52 = vpack.c.bf16 %v118_v49, %v106_v48  ;;  %v96_v55 = vld [vmem:[#allocation5 + $0xa0] sm:$0xff]  ;;  %v121_v58 = vld [vmem:[#allocation5 + $0x168] sm:$0xff]  ;;  %v87_v63 = vld [vmem:[#allocation5 + $0x58] sm:$0xff]  ;;  %v158_v49 = vsub.s32 7, %v3732_v13 }
  0x58   :  { %3176 = vmatprep.subr.bf16.mxu0 %v3175_v22  ;;  %v3197_v56 = vpack.c.bf16 %v96_v55, %v84_v54  ;;  %v3199_v59 = vpack.c.bf16 %v121_v58, %v109_v57  ;;  %v108_v60 = vld [vmem:[#allocation5 + $0x100] sm:$0xff]  ;;  %v99_v1 = vld [vmem:[#allocation5 + $0xb8] sm:$0xff]  ;;  %v86_v3 = vld [vmem:[#allocation5 + $0x50] sm:$0xff] }
  0x59   :  { %v120_v61 = vld [vmem:[#allocation5 + $0x160] sm:$0xff]  ;;  %v3203_v2 = vpack.c.bf16 %v99_v1, %v87_v63  ;;  %v98_v4 = vld [vmem:[#allocation5 + $0xb0] sm:$0xff]  ;;  %v111_v6 = vld [vmem:[#allocation5 + $0x118] sm:$0xff] }
  0x5a   :  { %2615 = vmatmul.mubr.msk.f32.gmra.mrb[2].mxu0 %vm188_vm0, %v3693_v27  ;;  %v3201_v62 = vpack.c.bf16 %v120_v61, %v108_v60  ;;  %v3205_v5 = vpack.c.bf16 %v98_v4, %v86_v3  ;;  %v123_v7 = vld [vmem:[#allocation5 + $0x178] sm:$0xff]  ;;  %v110_v9 = vld [vmem:[#allocation5 + $0x110] sm:$0xff]  ;;  %v124_v15 = vld [vmem:[#allocation7] sm:$0xff] }
  0x5b   :  { %3178 = vmatpush1.bf16.msra.mxu0 %v3177_v28  ;;  %336 = vmatprep.mubr.f32.mxu0 %v3591_v0  ;;  %v3207_v8 = vpack.c.bf16 %v123_v7, %v111_v6  ;;  %v122_v10 = vld [vmem:[#allocation5 + $0x170] sm:$0xff]  ;;  %v131_v19 = vrot.slane %v124_v15, %v130_v14  ;;  %v3754_v30 = vrot.slane %v124_v15, %v138_v25  ;;  %v3794_v57 = vld [vmem:[#allocation7 + $0x8] sm:$0xf] }
  0x5c   :  { %3180 = vmatprep.subr.bf16.mxu0 %v3179_v29  ;;  %3403 = vmatprep.subr.bf16.mxu1 %v3203_v2  ;;  %v3209_v11 = vpack.c.bf16 %v122_v10, %v110_v9  ;;  %v146_v29 = vsub.s32 4, %v3732_v13  ;;  %v3769_v42 = vrot.slane %v124_v15, %v150_v38  ;;  %v163_v58 = vrot.slane %v3794_v57, %v130_v14 }
  0x5d   :  { %3405 = vmatpush1.bf16.msra.mxu1 %v3205_v5 }
  0x5e   :  { %2616 = vmatmul.mubr.msk.f32.vlgmr.msra.gmra.mrb[4].mxu0 %vm188_vm0, %v3688_v20  ;;  %3404 = vmatprep.subr.bf16.mxu1 %v3207_v8 }
  0x5f   :  { %3182 = vmatpush1.bf16.msra.mxu0 %v3181_v34  ;;  %342 = vmatprep.mubr.f32.mxu0 %v3591_v0 }
  0x60   :  { %3184 = vmatprep.subr.bf16.mxu0 %v3183_v35  ;;  %v147_v35 = vrot.slane %v124_v15, %v146_v29  ;;  %v822_v29 = vld [vmem:[#allocation8 + $0x18] sm:$0xff] }
  0x61   :  { %3406 = vmatpush1.bf16.msra.mxu1 %v3209_v11 }
  0x62   :  { %2617 = vmatmul.mubr.msk.f32.gmra.mrb[6].mxu0 %vm188_vm0, %v3693_v27  ;;  %2808 = vmatprep.subr.mxu1 %v3591_v0 }
  0x63   :  { %3186 = vmatpush1.bf16.msra.mxu0 %v3185_v40  ;;  %413 = vmatprep.mubr.f32.mxu0 %v3591_v0 }
  0x64   :  { %3188 = vmatprep.subr.bf16.mxu0 %v3187_v41  ;;  %2625 = vmatmul.mubr.msk.f32.vlgmr.msra.gmra.mrb[0].mxu1 %vm188_vm0, %v3693_v27 }
  0x65   :  { %2810 = vmatprep.mubr.msk.f32.mxu1 %vm3592_vm1, %v3591_v0 }
  0x66   :  { %2618 = vmatmul.mubr.msk.f32.vlgmr.msra.gmra.mrb[8].mxu0 %vm188_vm0, %v3688_v20 }
  0x67   :  { %3190 = vmatpush1.bf16.msra.mxu0 %v3189_v46  ;;  %419 = vmatprep.mubr.f32.mxu0 %v3591_v0 }
  0x68   :  { %3192 = vmatprep.subr.bf16.mxu0 %v3191_v47  ;;  %v154_v47 = vsub.s32 6, %v3732_v13 }
  0x6a   :  { %2619 = vmatmul.mubr.msk.f32.gmra.mrb[10].mxu0 %vm188_vm0, %v3693_v27  ;;  %v3784_v51 = vrot.slane %v124_v15, %v154_v47  ;;  %v828_v47 = vld [vmem:[#allocation8 + $0x48] sm:$0xff] }
  0x6b   :  { %3194 = vmatpush1.bf16.msra.mxu0 %v3193_v52  ;;  %490 = vmatprep.mubr.f32.mxu0 %v3591_v0  ;;  %v3786_v52 = vrot.slane %v124_v15, %v158_v49 }
  0x6c   :  { %3196 = vmatprep.subr.bf16.mxu0 %v3195_v53 }
  0x6e   :  { %2620 = vmatmul.mubr.msk.f32.vlgmr.msra.gmra.mrb[12].mxu0 %vm188_vm0, %v3688_v20 }
  0x6f   :  { %3198 = vmatpush1.bf16.msra.mxu0 %v3197_v56  ;;  %496 = vmatprep.mubr.f32.mxu0 %v3591_v0 }
  0x70   :  { %3200 = vmatprep.subr.bf16.mxu0 %v3199_v59 }
  0x72   :  { %2621 = vmatmul.mubr.msk.f32.gmra.mrb[14].mxu0 %vm188_vm0, %v3693_v27 }
  0x73   :  { %567 = vmatprep.mubr.f32.mxu0 %v3591_v0  ;;  %3202 = vmatpush1.bf16.msra.mxu0 %v3201_v62  ;;  %v3800_v62 = vrot.slane %v3794_v57, %v134_v17 }
  0x74   :  { %3204 = vmatprep.subr.bf16.mxu0 %v3203_v2 }
  0x76   :  { %2622 = vmatmul.mubr.msk.f32.vlgmr.msra.gmra.mrb[16].mxu0 %vm188_vm0, %v3688_v20 }
  0x77   :  { %3206 = vmatpush1.bf16.msra.mxu0 %v3205_v5  ;;  %573 = vmatprep.mubr.f32.mxu0 %v3591_v0 }
  0x78   :  { %3208 = vmatprep.subr.bf16.mxu0 %v3207_v8 }
  0x7a   :  { %2623 = vmatmul.mubr.msk.f32.gmra.mrb[18].mxu0 %vm188_vm0, %v3693_v27  ;;  %v142_v27 = vsub.s32 3, %v3732_v13 }
  0x7b   :  { %3210 = vmatpush1.bf16.msra.mxu0 %v3209_v11  ;;  %644 = vmatprep.mubr.f32.mxu0 %v3591_v0 }
  0x7c   :  { %2803 = vmatprep.subr.mxu0 %v3591_v0  ;;  %v3758_v31 = vrot.slane %v124_v15, %v142_v27 }
  0x7e   :  { %2624 = vmatmul.mubr.msk.f32.vlgmr.msra.gmra.mrb[20].mxu0 %vm188_vm0, %v3688_v20  ;;  %v3738_v20 = vrot.slane %v124_v15, %v134_v17  ;;  %v819_v15 = vld [vmem:[#allocation8] sm:$0xff]  ;;  %v821_v17 = vld [vmem:[#allocation8 + $0x10] sm:$0xff] }
  0x7f   :  { %2805 = vmatprep.mubr.msk.f32.mxu0 %vm3592_vm1, %v3591_v0 }
 0x129   :  { %v261_v16 = vpop.f32.mrb[0].mxu0 }
 0x12a   :  { %v3736_v18 = vpop.f32.mrb[1].mxu0  ;;  %v262_v41 = vadd.f32 %v261_v16, %v131_v19  ;;  %v820_v16 = vld [vmem:[#allocation8 + $0x8] sm:$0xff] }
 0x12d   :  { %v267_v21 = vpop.f32.mrb[2].mxu0 }
 0x12e   :  { %v3740_v22 = vadd.f32 %v267_v21, %v131_v19  ;;  %v269_v23 = vpop.f32.mrb[3].mxu0  ;;  %v3593_v21 = vmov 0.0|0.0  }
 0x12f   :  { %v3743_v24 = vadd.f32 %v269_v23, %v3738_v20  ;;  %v3817_v23 = vpack.c.bf16 %v820_v16, %v819_v15 }
 0x131   :  { %v3746_v26 = vpop.f32.mrb[4].mxu0 }
 0x132   :  { %v3749_v28 = vpop.f32.mrb[5].mxu0 }
 0x135   :  { %v344_v32 = vpop.f32.mrb[6].mxu0 }
 0x136   :  { %v3761_v33 = vadd.f32 %v344_v32, %v3754_v30  ;;  %v346_v34 = vpop.f32.mrb[7].mxu0 }
 0x137   :  { %v3764_v36 = vadd.f32 %v346_v34, %v3758_v31  ;;  %v3814_v19 = vpop.f32.mrb[0].mxu1  ;;  %v3822_v34 = vpack.c.bf16 %v822_v29, %v821_v17 }
 0x138   :  { %v3819_v32 = vpop.f32.mrb[1].mxu1 }
 0x139   :  { %v415_v37 = vpop.f32.mrb[8].mxu0 }
 0x13a   :  { %v416_v39 = vadd.f32 %v415_v37, %v147_v35  ;;  %v3767_v40 = vpop.f32.mrb[9].mxu0  ;;  %v824_v37 = vld [vmem:[#allocation8 + $0x28] sm:$0xff] }
 0x13c   :  { %2804 = vmatpush3.xpose.msra.mxu0 %v416_v39  ;;  %v825_v39 = vld [vmem:[#allocation8 + $0x30] sm:$0xff] }
 0x13d   :  { %v421_v43 = vpop.f32.mrb[10].mxu0  ;;  %3211 = vmatprep.subr.bf16.mxu0 %v3593_v21 }
 0x13e   :  { %v3771_v44 = vadd.f32 %v421_v43, %v147_v35  ;;  %v423_v45 = vpop.f32.mrb[11].mxu0  ;;  %v823_v35 = vld [vmem:[#allocation8 + $0x20] sm:$0xff] }
 0x13f   :  { %2806 = vmatmul.mubr.f32.vlgmr.msra.gmra.mrb[22].mxu0 %v262_v41  ;;  %v3774_v46 = vadd.f32 %v423_v45, %v3769_v42  ;;  %v3826_v38 = vpack.c.bf16 %v824_v37, %v823_v35  ;;  %v826_v41 = vld [vmem:[#allocation8 + $0x38] sm:$0xff]  ;;  %v827_v45 = vld [vmem:[#allocation8 + $0x40] sm:$0xff]  ;;  %v1061_v37 = vld [vmem:[#allocation8 + $0x88] sm:$0xff] }
 0x140   :  { %2845 = vmatprep.mubr.msk.f32.mxu0 %vm3592_vm1, %v3591_v0  ;;  %3213 = vmatpush3.bf16.msra.mxu0 %v3817_v23  ;;  %v3830_v43 = vpack.c.bf16 %v826_v41, %v825_v39  ;;  %v3834_v49 = vpack.c.bf16 %v828_v47, %v827_v45  ;;  %v1060_v35 = vld [vmem:[#allocation8 + $0x80] sm:$0xff]  ;;  %v1062_v39 = vld [vmem:[#allocation8 + $0x90] sm:$0xff]  ;;  %v1063_v45 = vld [vmem:[#allocation8 + $0x98] sm:$0xff] }
 0x141   :  { %v3779_v48 = vpop.f32.mrb[12].mxu0  ;;  %3214 = vmatprep.subr.bf16.mxu0 %v3593_v21  ;;  %v3868_v41 = vpack.c.bf16 %v1061_v37, %v1060_v35  ;;  %v3871_v47 = vpack.c.bf16 %v1063_v45, %v1062_v39  ;;  %v3905_v37 = vrot.slane %v3794_v57, %v138_v25  ;;  %v339_v39 = vadd.f32 %v3746_v26, %v3754_v30 }
 0x142   :  { %v3782_v50 = vpop.f32.mrb[13].mxu0  ;;  %v493_v35 = vadd.f32 %v3779_v48, %v3784_v51 }
 0x144   :  { %3216 = vmatpush3.bf16.msra.mxu0 %v3822_v34 }
 0x145   :  { %v498_v53 = vpop.f32.mrb[14].mxu0  ;;  %3217 = vmatprep.subr.bf16.mxu0 %v3593_v21 }
 0x146   :  { %v3789_v54 = vadd.f32 %v498_v53, %v3784_v51  ;;  %v500_v55 = vpop.f32.mrb[15].mxu0  ;;  %v829_v53 = vld [vmem:[#allocation8 + $0x50] sm:$0xff] }
 0x147   :  { %v3792_v56 = vadd.f32 %v500_v55, %v3786_v52  ;;  %v830_v55 = vld [vmem:[#allocation8 + $0x58] sm:$0xff] }
 0x148   :  { %3219 = vmatpush3.bf16.msra.mxu0 %v3826_v38 }
 0x149   :  { %v569_v59 = vpop.f32.mrb[16].mxu0  ;;  %3220 = vmatprep.subr.bf16.mxu0 %v3593_v21 }
 0x14a   :  { %v570_v60 = vadd.f32 %v569_v59, %v163_v58  ;;  %v3797_v61 = vpop.f32.mrb[17].mxu0  ;;  %v831_v59 = vld [vmem:[#allocation8 + $0x60] sm:$0xff] }
 0x14b   :  { %v572_v15 = vadd.f32 %v3797_v61, %v3800_v62 }
 0x14c   :  { %2809 = vmatpush3.msra.mxu1 %v570_v60  ;;  %3222 = vmatpush3.bf16.msra.mxu0 %v3830_v43  ;;  %v832_v60 = vld [vmem:[#allocation8 + $0x68] sm:$0xff] }
 0x14d   :  { %v575_v63 = vpop.f32.mrb[18].mxu0  ;;  %2848 = vmatprep.subr.mxu1 %v3591_v0  ;;  %3223 = vmatprep.subr.bf16.mxu0 %v3593_v21 }
 0x14e   :  { %v3803_v1 = vadd.f32 %v575_v63, %v163_v58  ;;  %v577_v2 = vpop.f32.mrb[19].mxu0  ;;  %v3838_v58 = vpack.c.bf16 %v830_v55, %v829_v53  ;;  %v3842_v63 = vpack.c.bf16 %v832_v60, %v831_v59  ;;  %v1064_v53 = vld [vmem:[#allocation8 + $0xa0] sm:$0xff]  ;;  %v1065_v55 = vld [vmem:[#allocation8 + $0xa8] sm:$0xff]  ;;  %v1066_v60 = vld [vmem:[#allocation8 + $0xb0] sm:$0xff] }
 0x14f   :  { %v3806_v3 = vadd.f32 %v577_v2, %v3800_v62  ;;  %v833_v2 = vld [vmem:[#allocation8 + $0x70] sm:$0xff]  ;;  %v3875_v59 = vpack.c.bf16 %v1065_v55, %v1064_v53 }
 0x150   :  { %3225 = vmatpush3.bf16.msra.mxu0 %v3834_v49 }
 0x151   :  { %v3808_v4 = vpop.f32.mrb[20].mxu0  ;;  %3226 = vmatprep.subr.bf16.mxu0 %v3593_v21 }
 0x152   :  { %v3810_v5 = vpop.f32.mrb[21].mxu0 }
 0x154   :  { %3228 = vmatpush3.bf16.msra.mxu0 %v3838_v58 }
 0x155   :  { %3229 = vmatprep.subr.bf16.mxu0 %v3593_v21 }
 0x158   :  { %3231 = vmatpush3.bf16.msra.mxu0 %v3842_v63 }
 0x159   :  { %3232 = vmatprep.subr.bf16.mxu0 %v3593_v21 }
 0x212   :  { %v730_v6 = vpop.f32.mrb[22].mxu0 }
 0x213   :  { %v2807_v7 = vpop.f32.mrb[23].mxu0  ;;  %v735_v8 = vsel %vm734_vm2, %v730_v6, -inf }
 0x214   :  { %736 = vmax.xlane.f32.xlu0 %v735_v8 }
 0x2a1   :  { %v737_v9 = vpop.xlane.xlu0 %736 }
 0x2a2   :  { %v738_v10 = vsub.f32 %v730_v6, %v737_v9  ;;  %v834_v6 = vld [vmem:[#allocation8 + $0x78] sm:$0xff] }
 0x2a3   :  { %v3846_v7 = vpack.c.bf16 %v834_v6, %v833_v2  ;;  %v1067_v2 = vld [vmem:[#allocation8 + $0xb8] sm:$0xff] }
 0x2a4   :  { %v739_v11 = vmul.f32 1.442695, %v738_v10  ;;  %v3879_v6 = vpack.c.bf16 %v1067_v2, %v1066_v60  ;;  %v1301_v2 = vld [vmem:[#allocation8 + $0x100] sm:$0xff] }
 0x2a5   :  { %3234 = vmatpush3.bf16.msra.mxu0 %v3846_v7 }
 0x2a6   :  { %3433 = vpow2.f32 %v739_v11  ;;  %3235 = vmatprep.subr.bf16.mxu0 %v3593_v21  ;;  %v418_v11 = vadd.f32 %v3767_v40, %v3769_v42 }
 0x2b0   :  { %v3434_v12 = vpop.eup %3433 }
 0x2b1   :  { %v741_v14 = vsel %vm734_vm2, %v3434_v12, 0.0 }
 0x2b2   :  { %742 = vadd.xlane.f32.xlu0 %v741_v14  ;;  %v264_v14 = vadd.f32 %v3736_v18, %v3738_v20 }
 0x33f   :  { %v743_v8 = vpop.xlane.xlu0 %742 }
 0x340   :  { %3435 = vrcp.f32 %v743_v8  ;;  %v1068_v8 = vld [vmem:[#allocation8 + $0xc0] sm:$0xff] }
 0x34a   :  { %v3436_v9 = vpop.eup %3435 }
 0x34b   :  { %v745_v10 = vmul.f32 %v3436_v9, %v3434_v12  ;;  %v1069_v9 = vld [vmem:[#allocation8 + $0xc8] sm:$0xff] }
 0x34d   :  { %2811 = vmatmul.mubr.msk.f32.vlgmr.msra.gmra.mrb[2].mxu1 %vm734_vm2, %v745_v10  ;;  %v3883_v10 = vpack.c.bf16 %v1069_v9, %v1068_v8  ;;  %v1302_v8 = vld [vmem:[#allocation8 + $0x108] sm:$0xff]  ;;  %v1303_v9 = vld [vmem:[#allocation8 + $0x110] sm:$0xff] }
 0x34e   :  { %2849 = vmatpush3.xpose.msra.mxu1 %v418_v11  ;;  %2850 = vmatprep.mubr.msk.f32.mxu1 %vm3592_vm1, %v3591_v0  ;;  %v1070_v11 = vld [vmem:[#allocation8 + $0xd0] sm:$0xff] }
 0x34f   :  { %2853 = vmatprep.subr.mxu1 %v3591_v0 }
 0x351   :  { %2851 = vmatmul.mubr.f32.vlgmr.msra.gmra.mrb[4].mxu1 %v264_v14  ;;  %v1071_v14 = vld [vmem:[#allocation8 + $0xd8] sm:$0xff] }
 0x352   :  { %2854 = vmatpush3.msra.mxu1 %v572_v15  ;;  %2855 = vmatprep.mubr.msk.f32.mxu1 %vm3592_vm1, %v3591_v0  ;;  %v3887_v15 = vpack.c.bf16 %v1071_v14, %v1070_v11  ;;  %v3922_v11 = vpack.c.bf16 %v1302_v8, %v1301_v2  ;;  %v1304_v14 = vld [vmem:[#allocation8 + $0x118] sm:$0xff] }
 0x353   :  { %2893 = vmatprep.subr.mxu1 %v3591_v0 }
 0x420   :  { %v815_v40 = vpop.f32.mrb[2].mxu1 }
 0x421   :  { %v2812_v42 = vpop.f32.mrb[3].mxu1  ;;  %2846 = vmatmul.mubr.f32.vlgmr.msra.gmra.mrb[24].mxu0 %v815_v40  ;;  %v1072_v40 = vld [vmem:[#allocation8 + $0xe0] sm:$0xff] }
 0x422   :  { %2890 = vmatprep.mubr.msk.f32.mxu0 %vm3592_vm1, %v3591_v0  ;;  %3237 = vmatpush3.bf16.msra.mxu0 %v3868_v41  ;;  %v1073_v42 = vld [vmem:[#allocation8 + $0xe8] sm:$0xff] }
 0x423   :  { %3238 = vmatprep.subr.bf16.mxu0 %v3593_v21 }
 0x424   :  { %v972_v12 = vpop.f32.mrb[4].mxu1 }
 0x425   :  { %v2852_v18 = vpop.f32.mrb[5].mxu1  ;;  %v976_v20 = vsel %vm734_vm2, %v972_v12, -inf }
 0x426   :  { %977 = vmax.xlane.f32.xlu1 %v976_v20  ;;  %3240 = vmatpush3.bf16.msra.mxu0 %v3871_v47  ;;  %v1074_v18 = vld [vmem:[#allocation8 + $0xf0] sm:$0xff]  ;;  %v1075_v20 = vld [vmem:[#allocation8 + $0xf8] sm:$0xff] }
 0x427   :  { %3241 = vmatprep.subr.bf16.mxu0 %v3593_v21 }
 0x42a   :  { %3243 = vmatpush3.bf16.msra.mxu0 %v3875_v59 }
 0x42b   :  { %3244 = vmatprep.subr.bf16.mxu0 %v3593_v21 }
 0x42e   :  { %3246 = vmatpush3.bf16.msra.mxu0 %v3879_v6 }
 0x42f   :  { %3247 = vmatprep.subr.bf16.mxu0 %v3593_v21 }
 0x432   :  { %3249 = vmatpush3.bf16.msra.mxu0 %v3883_v10 }
 0x433   :  { %3250 = vmatprep.subr.bf16.mxu0 %v3593_v21 }
 0x436   :  { %3252 = vmatpush3.bf16.msra.mxu0 %v3887_v15 }
 0x437   :  { %3253 = vmatprep.subr.bf16.mxu0 %v3593_v21 }
 0x4b3   :  { %v978_v16 = vpop.xlane.xlu1 %977 }
 0x4b4   :  { %v979_v61 = vsub.f32 %v972_v12, %v978_v16  ;;  %v3891_v12 = vpack.c.bf16 %v1073_v42, %v1072_v40  ;;  %v3895_v16 = vpack.c.bf16 %v1075_v20, %v1074_v18  ;;  %v3925_v40 = vpack.c.bf16 %v1304_v14, %v1303_v9  ;;  %v1305_v42 = vld [vmem:[#allocation8 + $0x120] sm:$0xff]  ;;  %v1306_v18 = vld [vmem:[#allocation8 + $0x128] sm:$0xff] }
 0x4b5   :  { %v3929_v20 = vpack.c.bf16 %v1306_v18, %v1305_v42  ;;  %v495_v14 = vadd.f32 %v3782_v50, %v3786_v52  ;;  %v3959_v42 = vrot.slane %v3794_v57, %v142_v27  ;;  %v341_v18 = vadd.f32 %v3749_v28, %v3758_v31 }
 0x4b6   :  { %v980_v62 = vmul.f32 1.442695, %v979_v61  ;;  %3255 = vmatpush3.bf16.msra.mxu0 %v3891_v12 }
 0x4b7   :  { %3256 = vmatprep.subr.bf16.mxu0 %v3593_v21 }
 0x4b8   :  { %3437 = vpow2.f32 %v980_v62 }
 0x4ba   :  { %3258 = vmatpush3.bf16.msra.mxu0 %v3895_v16 }
 0x4bb   :  { %3259 = vmatprep.subr.bf16.mxu0 %v3593_v21 }
 0x4c2   :  { %v3438_v17 = vpop.eup %3437 }
 0x4c3   :  { %v982_v29 = vsel %vm734_vm2, %v3438_v17, 0.0 }
 0x4c4   :  { %983 = vadd.xlane.f32.xlu1 %v982_v29 }
 0x551   :  { %v984_v61 = vpop.xlane.xlu1 %983 }
 0x552   :  { %3439 = vrcp.f32 %v984_v61  ;;  %v1307_v61 = vld [vmem:[#allocation8 + $0x130] sm:$0xff] }
 0x55c   :  { %v3440_v62 = vpop.eup %3439 }
 0x55d   :  { %v986_v29 = vmul.f32 %v3440_v62, %v3438_v17  ;;  %v647_v17 = vadd.f32 %v3808_v4, %v3905_v37  ;;  %v1308_v62 = vld [vmem:[#allocation8 + $0x138] sm:$0xff] }
 0x55f   :  { %2856 = vmatmul.mubr.msk.f32.vlgmr.msra.gmra.mrb[6].mxu1 %vm734_vm2, %v986_v29  ;;  %v3933_v29 = vpack.c.bf16 %v1308_v62, %v1307_v61 }
 0x560   :  { %2894 = vmatpush3.xpose.msra.mxu1 %v493_v35  ;;  %2895 = vmatprep.mubr.msk.f32.mxu1 %vm3592_vm1, %v3591_v0  ;;  %v1309_v35 = vld [vmem:[#allocation8 + $0x140] sm:$0xff] }
 0x561   :  { %2898 = vmatprep.subr.mxu1 %v3591_v0 }
 0x563   :  { %2896 = vmatmul.mubr.f32.vlgmr.msra.gmra.mrb[8].mxu1 %v339_v39  ;;  %v1310_v39 = vld [vmem:[#allocation8 + $0x148] sm:$0xff] }
 0x564   :  { %2899 = vmatpush3.msra.mxu1 %v647_v17  ;;  %2900 = vmatprep.mubr.msk.f32.mxu1 %vm3592_vm1, %v3591_v0  ;;  %v3937_v17 = vpack.c.bf16 %v1310_v39, %v1309_v35  ;;  %v1542_v35 = vld [vmem:[#allocation8 + $0x180] sm:$0xff]  ;;  %v1543_v39 = vld [vmem:[#allocation8 + $0x188] sm:$0xff] }
 0x565   :  { %2938 = vmatprep.subr.mxu1 %v3591_v0 }
 0x632   :  { %v1056_v25 = vpop.f32.mrb[6].mxu1 }
 0x633   :  { %v2857_v48 = vpop.f32.mrb[7].mxu1  ;;  %2891 = vmatmul.mubr.f32.vlgmr.msra.gmra.mrb[24].mxu0 %v1056_v25  ;;  %v1311_v25 = vld [vmem:[#allocation8 + $0x150] sm:$0xff] }
 0x634   :  { %2935 = vmatprep.mubr.msk.f32.mxu0 %vm3592_vm1, %v3591_v0  ;;  %3261 = vmatpush3.bf16.msra.mxu0 %v3922_v11  ;;  %v1312_v48 = vld [vmem:[#allocation8 + $0x158] sm:$0xff] }
 0x635   :  { %3262 = vmatprep.subr.bf16.mxu0 %v3593_v21 }
 0x636   :  { %v1213_v51 = vpop.f32.mrb[8].mxu1 }
 0x637   :  { %v2897_v26 = vpop.f32.mrb[9].mxu1  ;;  %v1217_v30 = vsel %vm734_vm2, %v1213_v51, -inf }
 0x638   :  { %1218 = vmax.xlane.f32.xlu0 %v1217_v30  ;;  %3264 = vmatpush3.bf16.msra.mxu0 %v3925_v40  ;;  %v1313_v26 = vld [vmem:[#allocation8 + $0x160] sm:$0xff]  ;;  %v1314_v30 = vld [vmem:[#allocation8 + $0x168] sm:$0xff] }
 0x639   :  { %3265 = vmatprep.subr.bf16.mxu0 %v3593_v21 }
 0x63c   :  { %3267 = vmatpush3.bf16.msra.mxu0 %v3929_v20 }
 0x63d   :  { %3268 = vmatprep.subr.bf16.mxu0 %v3593_v21 }
 0x640   :  { %3270 = vmatpush3.bf16.msra.mxu0 %v3933_v29 }
 0x641   :  { %3271 = vmatprep.subr.bf16.mxu0 %v3593_v21 }
 0x644   :  { %3273 = vmatpush3.bf16.msra.mxu0 %v3937_v17 }
 0x645   :  { %3274 = vmatprep.subr.bf16.mxu0 %v3593_v21 }
 0x6c5   :  { %v1219_v45 = vpop.xlane.xlu0 %1218 }
 0x6c6   :  { %v1220_v4 = vsub.f32 %v1213_v51, %v1219_v45  ;;  %v3941_v51 = vpack.c.bf16 %v1312_v48, %v1311_v25  ;;  %v3945_v45 = vpack.c.bf16 %v1314_v30, %v1313_v26  ;;  %v1544_v25 = vld [vmem:[#allocation8 + $0x190] sm:$0xff]  ;;  %v3976_v48 = vpack.c.bf16 %v1543_v39, %v1542_v35  ;;  %v1545_v26 = vld [vmem:[#allocation8 + $0x198] sm:$0xff] }
 0x6c7   :  { %v3979_v30 = vpack.c.bf16 %v1545_v26, %v1544_v25 }
 0x6c8   :  { %v1221_v53 = vmul.f32 1.442695, %v1220_v4  ;;  %3276 = vmatpush3.bf16.msra.mxu0 %v3941_v51  ;;  %v1315_v4 = vld [vmem:[#allocation8 + $0x170] sm:$0xff] }
 0x6c9   :  { %3277 = vmatprep.subr.bf16.mxu0 %v3593_v21 }
 0x6ca   :  { %3441 = vpow2.f32 %v1221_v53  ;;  %v1316_v53 = vld [vmem:[#allocation8 + $0x178] sm:$0xff] }
 0x6cc   :  { %3279 = vmatpush3.bf16.msra.mxu0 %v3945_v45 }
 0x6cd   :  { %3280 = vmatprep.subr.bf16.mxu0 %v3593_v21 }
 0x6d4   :  { %v3442_v55 = vpop.eup %3441 }
 0x6d5   :  { %v1223_v60 = vsel %vm734_vm2, %v3442_v55, 0.0 }
 0x6d6   :  { %1224 = vadd.xlane.f32.xlu1 %v1223_v60  ;;  %v3949_v60 = vpack.c.bf16 %v1316_v53, %v1315_v4  ;;  %v1546_v4 = vld [vmem:[#allocation8 + $0x1a0] sm:$0xff]  ;;  %v1547_v53 = vld [vmem:[#allocation8 + $0x1a8] sm:$0xff] }
 0x6d8   :  { %3282 = vmatpush3.bf16.msra.mxu0 %v3949_v60 }
 0x6d9   :  { %3283 = vmatprep.subr.bf16.mxu0 %v3593_v21 }
 0x763   :  { %v1225_v2 = vpop.xlane.xlu1 %1224 }
 0x764   :  { %3443 = vrcp.f32 %v1225_v2  ;;  %v3983_v2 = vpack.c.bf16 %v1547_v53, %v1546_v4 }
 0x76e   :  { %v3444_v8 = vpop.eup %3443 }
 0x76f   :  { %v1227_v9 = vmul.f32 %v3444_v8, %v3442_v55  ;;  %v649_v55 = vadd.f32 %v3810_v5, %v3959_v42  ;;  %v1548_v8 = vld [vmem:[#allocation8 + $0x1b0] sm:$0xff] }
 0x771   :  { %2901 = vmatmul.mubr.msk.f32.vlgmr.msra.gmra.mrb[10].mxu1 %vm734_vm2, %v1227_v9  ;;  %v1549_v9 = vld [vmem:[#allocation8 + $0x1b8] sm:$0xff] }
 0x772   :  { %2939 = vmatpush3.xpose.msra.mxu1 %v495_v14  ;;  %2940 = vmatprep.mubr.msk.f32.mxu1 %vm3592_vm1, %v3591_v0  ;;  %v3987_v14 = vpack.c.bf16 %v1549_v9, %v1548_v8 }
 0x773   :  { %2943 = vmatprep.subr.mxu1 %v3591_v0 }
 0x775   :  { %2941 = vmatmul.mubr.f32.vlgmr.msra.gmra.mrb[12].mxu1 %v341_v18  ;;  %v1550_v18 = vld [vmem:[#allocation8 + $0x1c0] sm:$0xff] }
 0x776   :  { %2944 = vmatpush3.msra.mxu1 %v649_v55  ;;  %2945 = vmatprep.mubr.msk.f32.mxu1 %vm3592_vm1, %v3591_v0  ;;  %v1551_v55 = vld [vmem:[#allocation8 + $0x1c8] sm:$0xff] }
 0x777   :  { %2983 = vmatprep.subr.mxu1 %v3591_v0 }
 0x844   :  { %v1297_v13 = vpop.f32.mrb[10].mxu1 }
 0x845   :  { %v2902_v27 = vpop.f32.mrb[11].mxu1  ;;  %2936 = vmatmul.mubr.f32.vlgmr.msra.gmra.mrb[24].mxu0 %v1297_v13  ;;  %v3991_v13 = vpack.c.bf16 %v1551_v55, %v1550_v18 }
 0x846   :  { %2980 = vmatprep.mubr.msk.f32.mxu0 %vm3592_vm1, %v3591_v0  ;;  %3285 = vmatpush3.bf16.msra.mxu0 %v3976_v48  ;;  %v1552_v27 = vld [vmem:[#allocation8 + $0x1d0] sm:$0xff] }
 0x847   :  { %3286 = vmatprep.subr.bf16.mxu0 %v3593_v21 }
 0x848   :  { %v1454_v50 = vpop.f32.mrb[12].mxu1 }
 0x849   :  { %v2942_v28 = vpop.f32.mrb[13].mxu1  ;;  %v1458_v31 = vsel %vm734_vm2, %v1454_v50, -inf }
 0x84a   :  { %1459 = vmax.xlane.f32.xlu0 %v1458_v31  ;;  %3288 = vmatpush3.bf16.msra.mxu0 %v3979_v30  ;;  %v1554_v31 = vld [vmem:[#allocation8 + $0x1e0] sm:$0xff] }
 0x84b   :  { %3289 = vmatprep.subr.bf16.mxu0 %v3593_v21 }
 0x84e   :  { %3291 = vmatpush3.bf16.msra.mxu0 %v3983_v2 }
 0x84f   :  { %3292 = vmatprep.subr.bf16.mxu0 %v3593_v21 }
 0x852   :  { %3294 = vmatpush3.bf16.msra.mxu0 %v3987_v14 }
 0x853   :  { %3295 = vmatprep.subr.bf16.mxu0 %v3593_v21 }
 0x856   :  { %3297 = vmatpush3.bf16.msra.mxu0 %v3991_v13 }
 0x857   :  { %3298 = vmatprep.subr.bf16.mxu0 %v3593_v21 }
 0x8d7   :  { %v1460_v52 = vpop.xlane.xlu0 %1459 }
 0x8d8   :  { %v1461_v57 = vsub.f32 %v1454_v50, %v1460_v52  ;;  %v1553_v50 = vld [vmem:[#allocation8 + $0x1d8] sm:$0xff]  ;;  %v1555_v52 = vld [vmem:[#allocation8 + $0x1e8] sm:$0xff] }
 0x8d9   :  { %v3995_v28 = vpack.c.bf16 %v1553_v50, %v1552_v27 }
 0x8da   :  { %v1462_v5 = vmul.f32 1.442695, %v1461_v57  ;;  %v3999_v57 = vpack.c.bf16 %v1555_v52, %v1554_v31 }
 0x8db   :  { %3300 = vmatpush3.bf16.msra.mxu0 %v3995_v28 }
 0x8dc   :  { %3445 = vpow2.f32 %v1462_v5  ;;  %3301 = vmatprep.subr.bf16.mxu0 %v3593_v21  ;;  %v1556_v5 = vld [vmem:[#allocation8 + $0x1f0] sm:$0xff] }
 0x8df   :  { %3303 = vmatpush3.bf16.msra.mxu0 %v3999_v57 }
 0x8e0   :  { %3304 = vmatprep.subr.bf16.mxu0 %v3593_v21 }
 0x8e6   :  { %v3446_v61 = vpop.eup %3445 }
 0x8e7   :  { %v1464_v62 = vsel %vm734_vm2, %v3446_v61, 0.0 }
 0x8e8   :  { %1465 = vadd.xlane.f32.xlu1 %v1464_v62  ;;  %v1557_v62 = vld [vmem:[#allocation8 + $0x1f8] sm:$0xff] }
 0x8e9   :  { %v4003_v35 = vpack.c.bf16 %v1557_v62, %v1556_v5 }
 0x8eb   :  { %3306 = vmatpush3.bf16.msra.mxu0 %v4003_v35 }
 0x8ec   :  { %3118 = vmatprep.subr.mxu0 %v3591_v0 }
 0x975   :  { %v1466_v39 = vpop.xlane.xlu1 %1465 }
 0x976   :  { %3447 = vrcp.f32 %v1466_v39 }
 0x980   :  { %v3448_v25 = vpop.eup %3447 }
 0x981   :  { %v1468_v26 = vmul.f32 %v3448_v25, %v3446_v61 }
 0x983   :  { %2946 = vmatmul.mubr.msk.f32.vlgmr.msra.gmra.mrb[14].mxu1 %vm734_vm2, %v1468_v26 }
 0x984   :  { %2984 = vmatpush3.xpose.msra.mxu1 %v3771_v44  ;;  %2985 = vmatprep.mubr.msk.f32.mxu1 %vm3592_vm1, %v3591_v0 }
 0x985   :  { %2988 = vmatprep.subr.mxu1 %v3591_v0 }
 0x987   :  { %2986 = vmatmul.mubr.f32.vlgmr.msra.gmra.mrb[16].mxu1 %v3740_v22  ;;  %v655_v22 = vadd.f32 %v3819_v32, %v3959_v42  ;;  %v4032_v32 = vld [vmem:[%s4155_s4] ss:$0 sm:$0xff]  ;;  %s3594_s4 = smov [#allocation10]  }
 0x988   :  { %2989 = vmatpush3.msra.mxu1 %v3803_v1  ;;  %2990 = vmatprep.mubr.msk.f32.mxu1 %vm3592_vm1, %v3591_v0  ;;  %s2600_s19 = sshll.u32 %s3594_s4, 4  ;;  %s2601_s19 = int_to_ptr.vmem [resolvable:$true] %s2600_s19 }
 0x989   :  { %3307 = vmatprep.subr.bf16.mxu1 %v3593_v21  ;;  %s3553_s20 = scalar_lea.vmem %s2601_s19, 256  ;;  %p3558_p5 = scmp.lt.s32.totalorder %s2601_s19, %s2601_s19 }
 0x98a   :  { %p3554_p4 = scmp.ne.s32.totalorder %s2601_s19, %s3553_s20  ;;  %p3559_p6 = scmp.lt.s32.totalorder %s3553_s20, %s3553_s20 }
 0x98c   :  { %p3560_p7 = por %p3559_p6, %p3558_p5 }
 0x98e   :  { %p3561_p8 = pnand %p3560_p7, %p3554_p4 }
 0xa56   :  { %v1538_v4 = vpop.f32.mrb[14].mxu1 }
 0xa57   :  { %v2947_v61 = vpop.f32.mrb[15].mxu1  ;;  %2981 = vmatmul.mubr.f32.vlgmr.msra.gmra.mrb[24].mxu0 %v1538_v4 }
 0xa58   :  { %3119 = vmatpush3.xpose.msra.mxu0 %v3792_v56  ;;  %3120 = vmatprep.mubr.msk.f32.mxu0 %vm3592_vm1, %v3591_v0 }
 0xa59   :  { %3123 = vmatprep.subr.mxu0 %v3591_v0 }
 0xa5a   :  { %v1696_v44 = vpop.f32.mrb[16].mxu1 }
 0xa5b   :  { %v2987_v1 = vpop.f32.mrb[17].mxu1  ;;  %3121 = vmatmul.mubr.f32.vlgmr.msra.gmra.mrb[26].mxu0 %v3764_v36  ;;  %v1700_v53 = vsel %vm734_vm2, %v1696_v44, -inf }
 0xa5c   :  { %3124 = vmatpush3.msra.mxu0 %v655_v22  ;;  %1701 = vmax.xlane.f32.xlu0 %v1700_v53 }
 0xa5d   :  { %3125 = vmatprep.mubr.msk.f32.mxu0 %vm3592_vm1, %v3591_v0 }
 0xae9   :  { %v1702_v56 = vpop.xlane.xlu0 %1701 }
 0xaea   :  { %v1703_v8 = vsub.f32 %v1696_v44, %v1702_v56 }
 0xaec   :  { %v1704_v9 = vmul.f32 1.442695, %v1703_v8 }
 0xaee   :  { %3449 = vpow2.f32 %v1704_v9 }
 0xaf8   :  { %v3450_v18 = vpop.eup %3449 }
 0xaf9   :  { %v1706_v55 = vsel %vm734_vm2, %v3450_v18, 0.0 }
 0xafa   :  { %1707 = vadd.xlane.f32.xlu1 %v1706_v55 }
 0xb2a   :  { %v1624_v36 = vpop.f32.mrb[24].mxu0 }
 0xb2b   :  { %v3407_v42 = vadd.f32 %v4032_v32, %v1624_v36  ;;  %v2982_v27 = vpop.f32.mrb[25].mxu0 }
 0xb2d   :  { %1629 = vst [vmem:[#allocation10] sm:$0xff] %v3407_v42 }
 0xb2e   :  { %v2419_v50 = vpop.f32.mrb[26].mxu0 }
 0xb2f   :  { %v3122_v31 = vpop.f32.mrb[27].mxu0 }
 0xb87   :  { %v1708_v52 = vpop.xlane.xlu1 %1707 }
 0xb88   :  { %3451 = vrcp.f32 %v1708_v52 }
 0xb92   :  { %v3452_v5 = vpop.eup %3451 }
 0xb93   :  { %v1710_v62 = vmul.f32 %v3452_v5, %v3450_v18 }
 0xb95   :  { %2991 = vmatmul.mubr.msk.f32.vlgmr.msra.gmra.mrb[18].mxu1 %vm734_vm2, %v1710_v62 }
 0xb96   :  { %3309 = vmatpush3.bf16.msra.mxu1 %v3817_v23  ;;  %3025 = vmatprep.mubr.msk.f32.mxu1 %vm3592_vm1, %v3591_v0 }
 0xb97   :  { %3310 = vmatprep.subr.bf16.mxu1 %v3593_v21 }
 0xb9a   :  { %3312 = vmatpush3.bf16.msra.mxu1 %v3822_v34 }
 0xb9b   :  { %3313 = vmatprep.subr.bf16.mxu1 %v3593_v21 }
 0xb9e   :  { %3315 = vmatpush3.bf16.msra.mxu1 %v3826_v38 }
 0xb9f   :  { %3316 = vmatprep.subr.bf16.mxu1 %v3593_v21 }
 0xba2   :  { %3318 = vmatpush3.bf16.msra.mxu1 %v3830_v43 }
 0xba3   :  { %3319 = vmatprep.subr.bf16.mxu1 %v3593_v21 }
 0xba6   :  { %3321 = vmatpush3.bf16.msra.mxu1 %v3834_v49 }
 0xba7   :  { %3322 = vmatprep.subr.bf16.mxu1 %v3593_v21 }
 0xbaa   :  { %3324 = vmatpush3.bf16.msra.mxu1 %v3838_v58 }
 0xbab   :  { %3325 = vmatprep.subr.bf16.mxu1 %v3593_v21 }
 0xbae   :  { %3327 = vmatpush3.bf16.msra.mxu1 %v3842_v63 }
 0xbaf   :  { %3328 = vmatprep.subr.bf16.mxu1 %v3593_v21 }
 0xbb2   :  { %3330 = vmatpush3.bf16.msra.mxu1 %v3846_v7 }
 0xbb3   :  { %3028 = vmatprep.subr.mxu1 %v3591_v0 }
 0xc68   :  { %v1780_v23 = vpop.f32.mrb[18].mxu1 }
 0xc69   :  { %v2992_v34 = vpop.f32.mrb[19].mxu1  ;;  %3026 = vmatmul.mubr.f32.vlgmr.msra.gmra.mrb[20].mxu1 %v1780_v23 }
 0xc6a   :  { %3029 = vmatpush3.xpose.msra.mxu1 %v3774_v46  ;;  %3030 = vmatprep.mubr.msk.f32.mxu1 %vm3592_vm1, %v3591_v0 }
 0xc6b   :  { %3033 = vmatprep.subr.mxu1 %v3591_v0 }
 0xc6d   :  { %3031 = vmatmul.mubr.f32.vlgmr.msra.gmra.mrb[22].mxu1 %v3743_v24  ;;  %v2423_v24 = vsel %vm734_vm2, %v2419_v50, -inf }
 0xc6e   :  { %3034 = vmatpush3.msra.mxu1 %v3806_v3  ;;  %3035 = vmatprep.mubr.msk.f32.mxu1 %vm3592_vm1, %v3591_v0 }
 0xc6f   :  { %3331 = vmatprep.subr.bf16.mxu1 %v3593_v21 }
 0xd40   :  { %v1937_v38 = vpop.f32.mrb[22].mxu1 }
 0xd41   :  { %v3032_v43 = vpop.f32.mrb[23].mxu1  ;;  %v1941_v49 = vsel %vm734_vm2, %v1937_v38, -inf }
 0xd42   :  { %1942 = vmax.xlane.f32.xlu0 %v1941_v49 }
 0xdcf   :  { %v1943_v46 = vpop.xlane.xlu0 %1942 }
 0xdd0   :  { %v1944_v58 = vsub.f32 %v1937_v38, %v1943_v46 }
 0xdd2   :  { %v1945_v63 = vmul.f32 1.442695, %v1944_v58 }
 0xdd4   :  { %3453 = vpow2.f32 %v1945_v63 }
 0xdde   :  { %v3454_v7 = vpop.eup %3453 }
 0xddf   :  { %v1947_v39 = vsel %vm734_vm2, %v3454_v7, 0.0 }
 0xde0   :  { %1948 = vadd.xlane.f32.xlu1 %v1947_v39 }
 0xde4   :  { %2424 = vmax.xlane.f32.xlu1 %v2423_v24 }
 0xe6d   :  { %v1949_v3 = vpop.xlane.xlu1 %1948 }
 0xe6e   :  { %3455 = vrcp.f32 %v1949_v3 }
 0xe71   :  { %v2425_v25 = vpop.xlane.xlu1 %2424 }
 0xe72   :  { %v2426_v26 = vsub.f32 %v2419_v50, %v2425_v25 }
 0xe74   :  { %v2427_v4 = vmul.f32 1.442695, %v2426_v26 }
 0xe76   :  { %3457 = vpow2.f32 %v2427_v4 }
 0xe78   :  { %v3456_v61 = vpop.eup %3455 }
 0xe79   :  { %v1951_v22 = vmul.f32 %v3456_v61, %v3454_v7 }
 0xe7b   :  { %3036 = vmatmul.mubr.msk.f32.vlgmr.msra.gmra.mrb[24].mxu1 %vm734_vm2, %v1951_v22 }
 0xe7c   :  { %3333 = vmatpush3.bf16.msra.mxu1 %v3868_v41  ;;  %3070 = vmatprep.mubr.msk.f32.mxu1 %vm3592_vm1, %v3591_v0 }
 0xe7d   :  { %3334 = vmatprep.subr.bf16.mxu1 %v3593_v21 }
 0xe80   :  { %v3458_v44 = vpop.eup %3457  ;;  %3336 = vmatpush3.bf16.msra.mxu1 %v3871_v47 }
 0xe81   :  { %v2429_v1 = vsel %vm734_vm2, %v3458_v44, 0.0  ;;  %3337 = vmatprep.subr.bf16.mxu1 %v3593_v21 }
 0xe82   :  { %2430 = vadd.xlane.f32.xlu1 %v2429_v1 }
 0xe84   :  { %3339 = vmatpush3.bf16.msra.mxu1 %v3875_v59 }
 0xe85   :  { %3340 = vmatprep.subr.bf16.mxu1 %v3593_v21 }
 0xe88   :  { %3342 = vmatpush3.bf16.msra.mxu1 %v3879_v6 }
 0xe89   :  { %3343 = vmatprep.subr.bf16.mxu1 %v3593_v21 }
 0xe8c   :  { %3345 = vmatpush3.bf16.msra.mxu1 %v3883_v10 }
 0xe8d   :  { %3346 = vmatprep.subr.bf16.mxu1 %v3593_v21 }
 0xe90   :  { %3348 = vmatpush3.bf16.msra.mxu1 %v3887_v15  ;;  %v653_v15 = vadd.f32 %v3814_v19, %v3905_v37 }
 0xe91   :  { %3349 = vmatprep.subr.bf16.mxu1 %v3593_v21 }
 0xe94   :  { %3351 = vmatpush3.bf16.msra.mxu1 %v3891_v12 }
 0xe95   :  { %3352 = vmatprep.subr.bf16.mxu1 %v3593_v21 }
 0xe98   :  { %3354 = vmatpush3.bf16.msra.mxu1 %v3895_v16 }
 0xe99   :  { %3073 = vmatprep.subr.mxu1 %v3591_v0 }
 0xf0f   :  { %v2431_v41 = vpop.xlane.xlu1 %2430 }
 0xf10   :  { %3459 = vrcp.f32 %v2431_v41 }
 0xf1a   :  { %v3460_v47 = vpop.eup %3459 }
 0xf1b   :  { %v2433_v59 = vmul.f32 %v3460_v47, %v3458_v44 }
 0xf1d   :  { %3126 = vmatmul.mubr.msk.f32.vlgmr.msra.gmra.mrb[28].mxu0 %vm734_vm2, %v2433_v59 }
 0xf4e   :  { %v2021_v6 = vpop.f32.mrb[24].mxu1 }
 0xf4f   :  { %v3037_v10 = vpop.f32.mrb[25].mxu1  ;;  %3071 = vmatmul.mubr.f32.vlgmr.msra.gmra.mrb[20].mxu1 %v2021_v6 }
 0xf50   :  { %3074 = vmatpush3.xpose.msra.mxu1 %v3789_v54  ;;  %3075 = vmatprep.mubr.msk.f32.mxu1 %vm3592_vm1, %v3591_v0 }
 0xf51   :  { %3078 = vmatprep.subr.mxu1 %v3591_v0 }
 0xf53   :  { %3076 = vmatmul.mubr.f32.vlgmr.msra.gmra.mrb[26].mxu1 %v3761_v33 }
 0xf54   :  { %3079 = vmatpush3.msra.mxu1 %v653_v15  ;;  %3080 = vmatprep.mubr.msk.f32.mxu1 %vm3592_vm1, %v3591_v0 }
 0xf55   :  { %3355 = vmatprep.subr.bf16.mxu1 %v3593_v21 }
 0xff0   :  { %v2503_v12 = vpop.f32.mrb[28].mxu0 }
 0xff1   :  { %v3127_v16 = vpop.f32.mrb[29].mxu0 }
0x1026   :  { %v2178_v53 = vpop.f32.mrb[26].mxu1 }
0x1027   :  { %v3077_v54 = vpop.f32.mrb[27].mxu1  ;;  %v2182_v56 = vsel %vm734_vm2, %v2178_v53, -inf }
0x1028   :  { %2183 = vmax.xlane.f32.xlu0 %v2182_v56 }
0x10b5   :  { %v2184_v8 = vpop.xlane.xlu0 %2183 }
0x10b6   :  { %v2185_v9 = vsub.f32 %v2178_v53, %v2184_v8 }
0x10b8   :  { %v2186_v18 = vmul.f32 1.442695, %v2185_v9 }
0x10ba   :  { %3461 = vpow2.f32 %v2186_v18 }
0x10c4   :  { %v3462_v19 = vpop.eup %3461 }
0x10c5   :  { %v2188_v33 = vsel %vm734_vm2, %v3462_v19, 0.0 }
0x10c6   :  { %2189 = vadd.xlane.f32.xlu0 %v2188_v33 }
0x1153   :  { %v2190_v37 = vpop.xlane.xlu0 %2189 }
0x1154   :  { %3463 = vrcp.f32 %v2190_v37 }
0x115e   :  { %v3464_v55 = vpop.eup %3463 }
0x115f   :  { %v2192_v36 = vmul.f32 %v3464_v55, %v3462_v19 }
0x1161   :  { %3081 = vmatmul.mubr.msk.f32.vlgmr.msra.gmra.mrb[28].mxu1 %vm734_vm2, %v2192_v36 }
0x1162   :  { %3357 = vmatpush3.bf16.msra.mxu1 %v3922_v11  ;;  %3115 = vmatprep.mubr.msk.f32.mxu1 %vm3592_vm1, %v3591_v0 }
0x1163   :  { %3358 = vmatprep.subr.bf16.mxu1 %v3593_v21 }
0x1166   :  { %3360 = vmatpush3.bf16.msra.mxu1 %v3925_v40 }
0x1167   :  { %3361 = vmatprep.subr.bf16.mxu1 %v3593_v21 }
0x116a   :  { %3363 = vmatpush3.bf16.msra.mxu1 %v3929_v20 }
0x116b   :  { %3364 = vmatprep.subr.bf16.mxu1 %v3593_v21 }
0x116e   :  { %3366 = vmatpush3.bf16.msra.mxu1 %v3933_v29 }
0x116f   :  { %3367 = vmatprep.subr.bf16.mxu1 %v3593_v21 }
0x1172   :  { %3369 = vmatpush3.bf16.msra.mxu1 %v3937_v17 }
0x1173   :  { %3370 = vmatprep.subr.bf16.mxu1 %v3593_v21 }
0x1176   :  { %3372 = vmatpush3.bf16.msra.mxu1 %v3941_v51 }
0x1177   :  { %3373 = vmatprep.subr.bf16.mxu1 %v3593_v21 }
0x117a   :  { %3375 = vmatpush3.bf16.msra.mxu1 %v3945_v45 }
0x117b   :  { %3376 = vmatprep.subr.bf16.mxu1 %v3593_v21 }
0x117e   :  { %3378 = vmatpush3.bf16.msra.mxu1 %v3949_v60 }
0x117f   :  { %3379 = vmatprep.subr.bf16.mxu1 %v3593_v21 }
0x1234   :  { %v2262_v11 = vpop.f32.mrb[28].mxu1 }
0x1235   :  { %v3082_v40 = vpop.f32.mrb[29].mxu1  ;;  %3116 = vmatmul.mubr.f32.vlgmr.msra.gmra.mrb[20].mxu1 %v2262_v11 }
0x1236   :  { %3381 = vmatpush3.bf16.msra.mxu1 %v3976_v48  ;;  %3160 = vmatprep.mubr.msk.f32.mxu1 %vm3592_vm1, %v3591_v0 }
0x1237   :  { %3382 = vmatprep.subr.bf16.mxu1 %v3593_v21 }
0x123a   :  { %3384 = vmatpush3.bf16.msra.mxu1 %v3979_v30 }
0x123b   :  { %3385 = vmatprep.subr.bf16.mxu1 %v3593_v21 }
0x123e   :  { %3387 = vmatpush3.bf16.msra.mxu1 %v3983_v2 }
0x123f   :  { %3388 = vmatprep.subr.bf16.mxu1 %v3593_v21 }
0x1242   :  { %3390 = vmatpush3.bf16.msra.mxu1 %v3987_v14 }
0x1243   :  { %3391 = vmatprep.subr.bf16.mxu1 %v3593_v21 }
0x1246   :  { %3393 = vmatpush3.bf16.msra.mxu1 %v3991_v13 }
0x1247   :  { %3394 = vmatprep.subr.bf16.mxu1 %v3593_v21 }
0x124a   :  { %3396 = vmatpush3.bf16.msra.mxu1 %v3995_v28 }
0x124b   :  { %3397 = vmatprep.subr.bf16.mxu1 %v3593_v21 }
0x124e   :  { %3399 = vmatpush3.bf16.msra.mxu1 %v3999_v57 }
0x124f   :  { %3400 = vmatprep.subr.bf16.mxu1 %v3593_v21 }
0x1252   :  { %3402 = vmatpush3.bf16.msra.mxu1 %v4003_v35 }
0x1255   :  { %3161 = vmatmul.mubr.f32.vlgmr.msra.gmra.mrb[20].mxu1 %v2503_v12 }
0x1328   :  { %v2589_v0 = vpop.f32.mrb[20].mxu1 }
0x1329   :  { %v3408_v20 = vadd.f32 %v4032_v32, %v2589_v0  ;;  %v3162_v29 = vpop.f32.mrb[21].mxu1 }
0x132b   :  { %2594 = vst [vmem:[#allocation10 + $0x8] sm:$0xff] %v3408_v20 }
0x132c   :  { %3564 = shalt.err (!%p3561_p8)
}
0x132d   :  { %s3565_s23 = scalar_lea.hbm %s4156_s5, 256 }
0x132e   :  { %p3566_p9 = scmp.ne.s32.totalorder %s4156_s5, %s3565_s23  ;;  %p3569_p10 = scmp.lt.u32.totalorder %s3565_s23, %s4156_s5 }
0x1330   :  { %p3571_p11 = pnand %p3569_p10, %p3566_p9 }
0x1332   :  { %3574 = shalt.err (!%p3571_p11)
}
0x1333   :  { %2606 = dma.vmem_to_hbm [thread:$0]  %s2601_s19, 256, %s4156_s5, [#allocation4], %s3587_s1, %s3587_s1, %s3588_s17  }
0x1334   :  { %3581 = dma.done.wait [#allocation4], 256  }
0x1335   :  { %3582 = vsyncadd [#allocation4], 4294967040 }
0x1336   :  { %2610 = vsyncpa [#allocation3], 1 }
0x1337   :  { %2611 = vsyncpa [#allocation6], 1 }
0x1338   :  { %2612 = vsyncpa [#allocation9], 1 }
0x1339   :  { %2613 = vsyncpa [#allocation4], 1 }

</bundles_post_ra>
